<compile_context>
chip_gen: v7x
topology: tpu7x:2x2x1
jax: 0.10.0
libtpu: 0.0.40
codegen_flags: <defaults>
</compile_context>

<pallas_src>
import math
import functools

import jax
import jax.numpy as jnp
from jax import lax
from jax.experimental import pallas as pl
from jax.experimental.pallas import tpu as pltpu


# ----------------------- hardware-aware configuration -----------------------

@functools.lru_cache(maxsize=1)
def _hw_config():
    """Generation-aware tile / VMEM-limit defaults.
    v5e/v6e have 128 MiB physical VMEM (but a small default scoped limit, so
    set vmem_limit_bytes explicitly); v7x has only 64 MiB per TensorCore so
    tiles are re-derived, not reused.  Falls back to the conservative
    (v7x-safe) config if the hardware query is unavailable."""
    try:
        cap = int(pltpu.get_tpu_info().vmem_capacity_bytes)
    except Exception:
        cap = 64 << 20
    if cap >= (96 << 20):        # v5e / v6e class (128 MiB VMEM)
        return {"vmem_limit": 64 << 20, "tm": 512, "tn": 1024, "tk": 1024}
    else:                        # v7x class (64 MiB VMEM per TensorCore)
        return {"vmem_limit": 40 << 20, "tm": 256, "tn": 512, "tk": 512}


def _round_up(x, m):
    return ((x + m - 1) // m) * m


def _pick_tile(dim, preferred, align=128, prefer=256):
    """Largest divisor tile <= preferred; prefer 256-multiples (v6e/v7x MXU is
    2x256^2), then 128-multiples, else the full dimension (small demo shapes)."""
    if dim <= preferred:
        return dim
    for step in (prefer, align):
        t = (preferred // step) * step
        while t >= step:
            if dim % t == 0:
                return t
            t -= step
    return dim


def _pick_seq_tile(S, preferred):
    if S <= preferred:
        return S
    t = (preferred // 8) * 8
    while t >= 8:
        if S % t == 0:
            return t
        t -= 8
    return S


def _pad_rows(x, mult):
    """Pad the leading (row) axis to a multiple of `mult` — instead of the
    full-dimension block fallback which would blow up the acc scratch."""
    pad = (-x.shape[0]) % mult
    if pad:
        x = jnp.pad(x, ((0, pad),) + ((0, 0),) * (x.ndim - 1))
    return x


# ----------------------------- Pallas kernels ------------------------------

def _dense_bias_kernel(x_ref, w_ref, b_ref, o_ref, acc_ref, *, activation):
    """Tiled y = act(x @ W + b).  K is the reduction grid axis (axis 2)."""
    @pl.when(pl.program_id(2) == 0)
    def _():
        acc_ref[...] = jnp.zeros_like(acc_ref)

    acc_ref[...] += jnp.dot(x_ref[...], w_ref[...],
                            preferred_element_type=jnp.float32)

    @pl.when(pl.program_id(2) == pl.num_programs(2) - 1)
    def _():
        y = acc_ref[...] + b_ref[...].astype(jnp.float32)
        if activation == "gelu":
            # TODO(synk): PyTorch nn.GELU defaults to exact erf GELU; tanh
            # approximation is used here (EUP-friendly, matches the in-script
            # reference).
            y = jax.nn.gelu(y)
        o_ref[...] = y.astype(o_ref.dtype)


def dense_bias(x, w, b, *, activation="none", out_dtype=jnp.bfloat16):
    """y = act(x @ W + b), bf16 inputs, f32 accumulation, tiled over M/N/K."""
    cfg = _hw_config()
    M, K = x.shape
    _, N = w.shape
    tm = min(cfg["tm"], _round_up(M, 16))   # bf16 sublane granule
    tn = _pick_tile(N, cfg["tn"])           # lane-dense output tiles
    tk = _pick_tile(K, cfg["tk"])
    x_p = _pad_rows(x, tm)
    Mp = x_p.shape[0]
    out_bytes = jnp.dtype(out_dtype).itemsize
    cost = pl.CostEstimate(
        flops=2 * Mp * N * K,
        transcendentals=(Mp * N if activation == "gelu" else 0),
        bytes_accessed=2 * (Mp * K + K * N) + out_bytes * Mp * N)
    kern = functools.partial(_dense_bias_kernel, activation=activation)
    y = pl.pallas_call(
        kern,
        out_shape=jax.ShapeDtypeStruct((Mp, N), out_dtype),
        grid_spec=pltpu.PrefetchScalarGridSpec(
            num_scalar_prefetch=0,
            grid=(Mp // tm, N // tn, K // tk),
            in_specs=[
                pl.BlockSpec((tm, tk), lambda i, j, k: (i, k)),
                pl.BlockSpec((tk, tn), lambda i, j, k: (k, j)),
                pl.BlockSpec((1, tn), lambda i, j, k: (0, j)),
            ],
            out_specs=pl.BlockSpec((tm, tn), lambda i, j, k: (i, j)),
            scratch_shapes=[pltpu.VMEM((tm, tn), jnp.float32)],
        ),
        compiler_params=pltpu.CompilerParams(
            dimension_semantics=("parallel", "parallel", "arbitrary"),
            vmem_limit_bytes=cfg["vmem_limit"]),
        cost_estimate=cost,
    )(x_p, w, b.reshape(1, N))
    return y[:M] if Mp != M else y


def _dense_ln_kernel(x_ref, w_ref, b_ref, res_ref, g_ref, bt_ref,
                     o_ref, acc_ref, *, eps):
    """Tiled o = LayerNorm(x @ W + b + res) * gamma + beta.
    N (hidden) is kept whole per tile so the row statistics are exact."""
    @pl.when(pl.program_id(1) == 0)
    def _():
        acc_ref[...] = jnp.zeros_like(acc_ref)

    acc_ref[...] += jnp.dot(x_ref[...], w_ref[...],
                            preferred_element_type=jnp.float32)

    @pl.when(pl.program_id(1) == pl.num_programs(1) - 1)
    def _():
        h = (acc_ref[...] + b_ref[...].astype(jnp.float32)
             + res_ref[...].astype(jnp.float32))
        mu = jnp.mean(h, axis=-1, keepdims=True)
        d = h - mu
        var = jnp.mean(d * d, axis=-1, keepdims=True)
        y = d * lax.rsqrt(var + eps)
        o_ref[...] = (y * g_ref[...].astype(jnp.float32)
                      + bt_ref[...].astype(jnp.float32)).astype(o_ref.dtype)


def dense_bias_add_ln(x, w, b, res, gamma, beta, *, eps=1e-12,
                      out_dtype=jnp.bfloat16):
    cfg = _hw_config()
    M, K = x.shape
    _, N = w.shape
    tm = min(cfg["tm"], _round_up(M, 16))
    tk = _pick_tile(K, cfg["tk"])
    x_p = _pad_rows(x, tm)
    res_p = _pad_rows(res, tm)
    Mp = x_p.shape[0]
    out_bytes = jnp.dtype(out_dtype).itemsize
    cost = pl.CostEstimate(
        flops=2 * Mp * N * K + 10 * Mp * N,
        transcendentals=Mp,
        bytes_accessed=2 * (Mp * K + K * N + Mp * N) + out_bytes * Mp * N)
    kern = functools.partial(_dense_ln_kernel, eps=eps)
    y = pl.pallas_call(
        kern,
        out_shape=jax.ShapeDtypeStruct((Mp, N), out_dtype),
        grid_spec=pltpu.PrefetchScalarGridSpec(
            num_scalar_prefetch=0,
            grid=(Mp // tm, K // tk),
            in_specs=[
                pl.BlockSpec((tm, tk), lambda i, k: (i, k)),
                pl.BlockSpec((tk, N), lambda i, k: (k, 0)),
                pl.BlockSpec((1, N), lambda i, k: (0, 0)),
                pl.BlockSpec((tm, N), lambda i, k: (i, 0)),   # residual (resident)
                pl.BlockSpec((1, N), lambda i, k: (0, 0)),
                pl.BlockSpec((1, N), lambda i, k: (0, 0)),
            ],
            out_specs=pl.BlockSpec((tm, N), lambda i, k: (i, 0)),
            scratch_shapes=[pltpu.VMEM((tm, N), jnp.float32)],
        ),
        compiler_params=pltpu.CompilerParams(
            dimension_semantics=("parallel", "arbitrary"),
            vmem_limit_bytes=cfg["vmem_limit"]),
        cost_estimate=cost,
    )(x_p, w, b.reshape(1, N), res_p, gamma.reshape(1, N), beta.reshape(1, N))
    return y[:M] if Mp != M else y


def _ln_kernel(x_ref, g_ref, b_ref, o_ref, *, eps):
    """Plain LayerNorm over the last dim (no residual, no zeros slab)."""
    h = x_ref[...].astype(jnp.float32)
    mu = jnp.mean(h, axis=-1, keepdims=True)
    d = h - mu
    var = jnp.mean(d * d, axis=-1, keepdims=True)
    o_ref[...] = (d * lax.rsqrt(var + eps) * g_ref[...]
                  + b_ref[...]).astype(o_ref.dtype)


def layernorm(x, gamma, beta, *, eps=1e-12, out_dtype=jnp.bfloat16):
    cfg = _hw_config()
    M, H = x.shape
    tm = min(cfg["tm"], _round_up(M, 8))
    x_p = _pad_rows(x, tm)
    Mp = x_p.shape[0]
    kern = functools.partial(_ln_kernel, eps=eps)
    y = pl.pallas_call(
        kern,
        out_shape=jax.ShapeDtypeStruct((Mp, H), out_dtype),
        grid_spec=pltpu.PrefetchScalarGridSpec(
            num_scalar_prefetch=0,
            grid=(Mp // tm,),
            in_specs=[pl.BlockSpec((tm, H), lambda i: (i, 0)),
                      pl.BlockSpec((1, H), lambda i: (0, 0)),
                      pl.BlockSpec((1, H), lambda i: (0, 0))],
            out_specs=pl.BlockSpec((tm, H), lambda i: (i, 0)),
        ),
        compiler_params=pltpu.CompilerParams(
            dimension_semantics=("parallel",),
            vmem_limit_bytes=cfg["vmem_limit"]),
    )(x_p, gamma.reshape(1, H), beta.reshape(1, H))
    return y[:M] if Mp != M else y


def _attn_kernel(q_ref, k_ref, v_ref, o_ref, *, scale):
    """One (batch, head, query-tile) per grid step on head-major blocks.
    Lane-dense per-head Q/K/V loads and a single lane-dense [tq, Dh] store;
    no in-kernel head slicing or concatenation."""
    q = q_ref[0, 0]                                   # [tq, Dh] bf16
    k = k_ref[0, 0]                                   # [S,  Dh] bf16
    v = v_ref[0, 0]                                   # [S,  Dh] bf16
    # contract last dims directly (no in-kernel k.T / XLU transpose)
    s = lax.dot_general(q, k, (((1,), (1,)), ((), ())),
                        preferred_element_type=jnp.float32) * scale
    s = s - jnp.max(s, axis=-1, keepdims=True)
    p = jnp.exp(s)
    p = p * pl.reciprocal(jnp.sum(p, axis=-1, keepdims=True), approx=True)
    o_ref[0, 0] = jnp.dot(p.astype(v.dtype), v,
                          preferred_element_type=jnp.float32).astype(o_ref.dtype)


def multihead_attention(q, k, v, *, out_dtype=jnp.bfloat16, tq=256):
    """q, k, v: head-major [B, nH, S, Dh] -> context [B, nH, S, Dh].
    grid=(B, nH, S//tq), all axes parallel (>= 2 units for v7x's 2 TCs).
    No attention mask, matching the reference forward."""
    B, nH, S, Dh = q.shape
    cfg = _hw_config()
    tq = _pick_seq_tile(S, tq)
    kern = functools.partial(_attn_kernel, scale=1.0 / math.sqrt(Dh))
    return pl.pallas_call(
        kern,
        out_shape=jax.ShapeDtypeStruct((B, nH, S, Dh), out_dtype),
        grid_spec=pltpu.PrefetchScalarGridSpec(
            num_scalar_prefetch=0,
            grid=(B, nH, S // tq),
            in_specs=[
                pl.BlockSpec((1, 1, tq, Dh), lambda b, h, i: (b, h, i, 0)),
                pl.BlockSpec((1, 1, S, Dh), lambda b, h, i: (b, h, 0, 0)),
                pl.BlockSpec((1, 1, S, Dh), lambda b, h, i: (b, h, 0, 0)),
            ],
            out_specs=pl.BlockSpec((1, 1, tq, Dh), lambda b, h, i: (b, h, i, 0)),
        ),
        compiler_params=pltpu.CompilerParams(
            dimension_semantics=("parallel", "parallel", "parallel"),
            vmem_limit_bytes=cfg["vmem_limit"]),
    )(q, k, v)


# --------------------------- parameter creation ----------------------------

def init_bert_params(key, vocab, max_pos, H, F, L):
    def nxt():
        nonlocal key
        key, sub = jax.random.split(key)
        return sub

    def w(shape):   # weights in bf16 (MXU-native); biases / LN params in f32
        return (jax.random.normal(nxt(), shape, jnp.float32) * 0.02
                ).astype(jnp.bfloat16)

    def bias(n):
        return jax.random.normal(nxt(), (n,), jnp.float32) * 0.02

    params = {
        "word_emb": jax.random.normal(nxt(), (vocab, H), jnp.float32) * 0.02,
        "pos_emb": jax.random.normal(nxt(), (max_pos, H), jnp.float32) * 0.02,
        "emb_ln_g": jnp.ones((H,), jnp.float32),
        "emb_ln_b": jnp.zeros((H,), jnp.float32),
        "layers": [],
    }
    for _ in range(L):
        params["layers"].append({
            "w_qkv": w((H, 3 * H)), "b_qkv": bias(3 * H),
            "w_o": w((H, H)), "b_o": bias(H),
            "ln1_g": jnp.ones((H,), jnp.float32),
            "ln1_b": jnp.zeros((H,), jnp.float32),
            "w_ffn1": w((H, F)), "b_ffn1": bias(F),
            "w_ffn2": w((F, H)), "b_ffn2": bias(H),
            "ln2_g": jnp.ones((H,), jnp.float32),
            "ln2_b": jnp.zeros((H,), jnp.float32),
        })
    return params


# ------------------------------ forward pass -------------------------------

def text_learnable_encoder_forward(params, textFea, maskTexts, *, nH):
    """Matches TextLearnableEncoder.forward: returns backbone(textFea).
    maskTexts is accepted but unused (exactly as in the reference)."""
    del maskTexts
    B, S = textFea.shape
    H = params["word_emb"].shape[1]
    Dh = H // nH

    # Embedding gather + positional add kept as cheap JAX glue.
    # TODO(synk): embedding gather stays in XLA (no blocked-gather kernel here).
    h = params["word_emb"][textFea] + params["pos_emb"][:S][None, :, :]
    h = layernorm(h.reshape(B * S, H), params["emb_ln_g"], params["emb_ln_b"],
                  out_dtype=jnp.bfloat16)
    # TODO(synk): folding the embedding LN / per-layer LN1 into the following
    # matmul prologue would save one activation HBM round-trip each; skipped
    # here to keep the residual-stream bookkeeping simple.

    n_layers = len(params["layers"])
    for li, lyr in enumerate(params["layers"]):
        # fused Q/K/V projection: h is read once, output is the [M, 3H] slab.
        qkv = dense_bias(h, lyr["w_qkv"], lyr["b_qkv"], out_dtype=jnp.bfloat16)

        # head-major layout plumbing (wrapper-side XLA reshape/transpose only)
        qkv5 = qkv.reshape(B, S, 3, nH, Dh)
        q = jnp.transpose(qkv5[:, :, 0], (0, 2, 1, 3))   # [B, nH, S, Dh]
        k = jnp.transpose(qkv5[:, :, 1], (0, 2, 1, 3))
        v = jnp.transpose(qkv5[:, :, 2], (0, 2, 1, 3))
        ctx = multihead_attention(q, k, v, out_dtype=jnp.bfloat16)
        ctx = jnp.transpose(ctx, (0, 2, 1, 3)).reshape(B * S, H)

        # output projection + bias + residual + LayerNorm fused into one pass
        h = dense_bias_add_ln(ctx, lyr["w_o"], lyr["b_o"], h,
                              lyr["ln1_g"], lyr["ln1_b"],
                              out_dtype=jnp.bfloat16)

        # FFN: matmul + bias + GELU fused; second matmul fuses bias+res+LN.
        ffn = dense_bias(h, lyr["w_ffn1"], lyr["b_ffn1"], activation="gelu",
                         out_dtype=jnp.bfloat16)
        last = li == n_layers - 1
        h = dense_bias_add_ln(ffn, lyr["w_ffn2"], lyr["b_ffn2"], h,
                              lyr["ln2_g"], lyr["ln2_b"],
                              out_dtype=jnp.float32 if last else jnp.bfloat16)

    return h.reshape(B, S, H)   # BERT last hidden state


# ------------------------- pure-JAX reference (f32) -------------------------

def _reference_forward(params, textFea, *, nH):
    B, S = textFea.shape
    H = params["word_emb"].shape[1]
    Dh = H // nH

    def ln(x, g, b, eps=1e-12):
        mu = x.mean(-1, keepdims=True)
        var = ((x - mu) ** 2).mean(-1, keepdims=True)
        return (x - mu) * lax.rsqrt(var + eps) * g + b

    h = params["word_emb"][textFea] + params["pos_emb"][:S][None]
    h = ln(h.reshape(B * S, H), params["emb_ln_g"], params["emb_ln_b"])
    for lyr in params["layers"]:
        qkv = h @ lyr["w_qkv"].astype(jnp.float32) + lyr["b_qkv"]
        q, k, v = jnp.split(qkv.reshape(B, S, 3 * H), 3, axis=-1)

        def heads(x):
            return x.reshape(B, S, nH, Dh).transpose(0, 2, 1, 3)

        q, k, v = heads(q), heads(k), heads(v)
        s = jnp.einsum("bhqd,bhkd->bhqk", q, k) / math.sqrt(Dh)
        p = jax.nn.softmax(s, axis=-1)
        ctx = jnp.einsum("bhqk,bhkd->bhqd", p, v)
        ctx = ctx.transpose(0, 2, 1, 3).reshape(B * S, H)
        h = ln(ctx @ lyr["w_o"].astype(jnp.float32) + lyr["b_o"] + h,
               lyr["ln1_g"], lyr["ln1_b"])
        f = jax.nn.gelu(h @ lyr["w_ffn1"].astype(jnp.float32) + lyr["b_ffn1"])
        h = ln(f @ lyr["w_ffn2"].astype(jnp.float32) + lyr["b_ffn2"] + h,
               lyr["ln2_g"], lyr["ln2_b"])
    return h.reshape(B, S, H)


# ----------------------------------- main -----------------------------------

if __name__ == "__main__":
    # Small shapes consistent with the module's forward (text tokens -> BERT).
    B, S = 2, 8
    VOCAB, MAX_POS = 100, 64
    H, nH, FFN, LAYERS = 32, 4, 64, 2

    key = jax.random.PRNGKey(0)
    k_param, k_ids = jax.random.split(key)

    params = init_bert_params(k_param, VOCAB, MAX_POS, H, FFN, LAYERS)
    textFea = jax.random.randint(k_ids, (B, S), 0, VOCAB, dtype=jnp.int32)
    maskTexts = jnp.ones((B, S), jnp.int32)   # unused in forward, as in PyTorch

    fwd = jax.jit(functools.partial(text_learnable_encoder_forward, nH=nH))
    out = jax.block_until_ready(fwd(params, textFea, maskTexts))

    assert out.shape == (B, S, H) and out.dtype == jnp.float32
    assert bool(jnp.isfinite(out).all())

    # loose check vs an f32 pure-JAX reference (kernel path runs bf16 matmuls)
    ref = _reference_forward(params, textFea, nH=nH)
    assert float(jnp.max(jnp.abs(out - ref))) < 0.2

    print("KERNEL_OK")
</pallas_src>

<mosaic_0001>
module attributes {stable_mosaic.version = 11 : i64} {
  func.func @_ln_kernel(%arg0: i32, %arg1: memref<16x32xf32, #tpu.memory_space<vmem>>, %arg2: memref<1x32xf32, #tpu.memory_space<vmem>>, %arg3: memref<1x32xf32, #tpu.memory_space<vmem>>, %arg4: memref<16x32xbf16, #tpu.memory_space<vmem>>) attributes {dimension_semantics = [#tpu.dimension_semantics<parallel>], iteration_bounds = array<i64: 1>, scalar_prefetch = 0 : i64, scratch_operands = 0 : i64, tpu.core_type = #tpu.core_type<tc>, window_params = [{transform_indices = @transform_0, window_bounds = array<i64: 16, 32>}, {pipeline_mode = #tpu.pipeline_mode<synchronous>, transform_indices = @transform_1, window_bounds = array<i64: 1, 32>}, {pipeline_mode = #tpu.pipeline_mode<synchronous>, transform_indices = @transform_2, window_bounds = array<i64: 1, 32>}, {transform_indices = @transform_3, window_bounds = array<i64: 16, 32>}]} {
    %c0 = arith.constant 0 : index
    %c0_0 = arith.constant 0 : index
    %0 = vector.load %arg1[%c0, %c0_0] : memref<16x32xf32, #tpu.memory_space<vmem>>, vector<16x32xf32>
    %cst = arith.constant dense<0.000000e+00> : vector<16xf32>
    %1 = vector.multi_reduction <add>, %0, %cst [1] : vector<16x32xf32> to vector<16xf32>
    %2 = vector.shape_cast %1 : vector<16xf32> to vector<16x1xf32>
    %cst_1 = arith.constant 3.200000e+01 : f32
    %3 = vector.broadcast %cst_1 : f32 to vector<16x1xf32>
    %4 = arith.divf %2, %3 : vector<16x1xf32>
    %5 = vector.broadcast %4 : vector<16x1xf32> to vector<16x32xf32>
    %6 = arith.subf %0, %5 : vector<16x32xf32>
    %7 = arith.mulf %6, %6 : vector<16x32xf32>
    %cst_2 = arith.constant dense<0.000000e+00> : vector<16xf32>
    %8 = vector.multi_reduction <add>, %7, %cst_2 [1] : vector<16x32xf32> to vector<16xf32>
    %9 = vector.shape_cast %8 : vector<16xf32> to vector<16x1xf32>
    %cst_3 = arith.constant 3.200000e+01 : f32
    %10 = vector.broadcast %cst_3 : f32 to vector<16x1xf32>
    %11 = arith.divf %9, %10 : vector<16x1xf32>
    %cst_4 = arith.constant 9.99999996E-13 : f32
    %12 = vector.broadcast %cst_4 : f32 to vector<16x1xf32>
    %13 = arith.addf %11, %12 : vector<16x1xf32>
    %14 = math.rsqrt %13 : vector<16x1xf32>
    %15 = vector.broadcast %14 : vector<16x1xf32> to vector<16x32xf32>
    %16 = arith.mulf %6, %15 : vector<16x32xf32>
    %c0_5 = arith.constant 0 : index
    %c0_6 = arith.constant 0 : index
    %17 = vector.load %arg2[%c0_5, %c0_6] : memref<1x32xf32, #tpu.memory_space<vmem>>, vector<1x32xf32>
    %18 = vector.broadcast %17 : vector<1x32xf32> to vector<16x32xf32>
    %19 = arith.mulf %16, %18 : vector<16x32xf32>
    %c0_7 = arith.constant 0 : index
    %c0_8 = arith.constant 0 : index
    %20 = vector.load %arg3[%c0_7, %c0_8] : memref<1x32xf32, #tpu.memory_space<vmem>>, vector<1x32xf32>
    %21 = vector.broadcast %20 : vector<1x32xf32> to vector<16x32xf32>
    %22 = arith.addf %19, %21 : vector<16x32xf32>
    %23 = arith.truncf %22 : vector<16x32xf32> to vector<16x32xbf16>
    %c0_9 = arith.constant 0 : index
    %c0_10 = arith.constant 0 : index
    %24 = vector.load %arg4[%c0_9, %c0_10] : memref<16x32xbf16, #tpu.memory_space<vmem>>, vector<16x32xbf16>
    tpu.vector_store %arg4[%c0_9, %c0_10], %23 {strides = array<i32>} : memref<16x32xbf16, #tpu.memory_space<vmem>>, vector<16x32xbf16>,
    return
  }
  func.func @transform_0(%arg0: i32) -> (i32, i32) {
    %c0_i32 = arith.constant 0 : i32
    %c0_i32_0 = arith.constant 0 : i32
    return %arg0, %c0_i32 : i32, i32
  }
  func.func @transform_1(%arg0: i32) -> (i32, i32) {
    %c0_i32 = arith.constant 0 : i32
    %c0_i32_0 = arith.constant 0 : i32
    %c0_i32_1 = arith.constant 0 : i32
    return %c0_i32, %c0_i32_0 : i32, i32
  }
  func.func @transform_2(%arg0: i32) -> (i32, i32) {
    %c0_i32 = arith.constant 0 : i32
    %c0_i32_0 = arith.constant 0 : i32
    %c0_i32_1 = arith.constant 0 : i32
    return %c0_i32, %c0_i32_0 : i32, i32
  }
  func.func @transform_3(%arg0: i32) -> (i32, i32) {
    %c0_i32 = arith.constant 0 : i32
    %c0_i32_0 = arith.constant 0 : i32
    return %arg0, %c0_i32 : i32, i32
  }
}

module attributes {stable_mosaic.version = 11 : i64} {
  func.func @_dense_bias_kernel(%arg0: i32, %arg1: i32, %arg2: i32, %arg3: memref<16x32xbf16, #tpu.memory_space<vmem>>, %arg4: memref<32x96xbf16, #tpu.memory_space<vmem>>, %arg5: memref<1x96xf32, #tpu.memory_space<vmem>>, %arg6: memref<16x96xbf16, #tpu.memory_space<vmem>>, %arg7: memref<16x96xf32, #tpu.memory_space<vmem>>) attributes {dimension_semantics = [#tpu.dimension_semantics<parallel>, #tpu.dimension_semantics<parallel>, #tpu.dimension_semantics<arbitrary>], iteration_bounds = array<i64: 1, 1, 1>, scalar_prefetch = 0 : i64, scratch_operands = 1 : i64, tpu.core_type = #tpu.core_type<tc>, window_params = [{transform_indices = @transform_0, window_bounds = array<i64: 16, 32>}, {transform_indices = @transform_1, window_bounds = array<i64: 32, 96>}, {transform_indices = @transform_2, window_bounds = array<i64: 1, 96>}, {transform_indices = @transform_3, window_bounds = array<i64: 16, 96>}]} {
    %c0_i32 = arith.constant 0 : i32
    %0 = arith.cmpi eq, %arg2, %c0_i32 : i32
    %1 = arith.extui %0 : i1 to i32
    %c0_i32_0 = arith.constant 0 : i32
    %2 = arith.cmpi ne, %1, %c0_i32_0 : i32
    scf.if %2 {
      %cst_10 = arith.constant 0.000000e+00 : f32
      %12 = vector.broadcast %cst_10 : f32 to vector<16x96xf32>
      %c0_11 = arith.constant 0 : index
      %c0_12 = arith.constant 0 : index
      %13 = vector.load %arg7[%c0_11, %c0_12] : memref<16x96xf32, #tpu.memory_space<vmem>>, vector<16x96xf32>
      tpu.vector_store %arg7[%c0_11, %c0_12], %12 {strides = array<i32>} : memref<16x96xf32, #tpu.memory_space<vmem>>, vector<16x96xf32>,
    } else {
    }
    %c0 = arith.constant 0 : index
    %c0_1 = arith.constant 0 : index
    %3 = vector.load %arg7[%c0, %c0_1] : memref<16x96xf32, #tpu.memory_space<vmem>>, vector<16x96xf32>
    %c0_2 = arith.constant 0 : index
    %c0_3 = arith.constant 0 : index
    %4 = vector.load %arg3[%c0_2, %c0_3] : memref<16x32xbf16, #tpu.memory_space<vmem>>, vector<16x32xbf16>
    %c0_4 = arith.constant 0 : index
    %c0_5 = arith.constant 0 : index
    %5 = vector.load %arg4[%c0_4, %c0_5] : memref<32x96xbf16, #tpu.memory_space<vmem>>, vector<32x96xbf16>
    %cst = arith.constant dense<0.000000e+00> : vector<16x96xf32>
    %6 = tpu.matmul %4, %5, %cst {dimension_numbers = #tpu.dot_dimension_numbers<[1], [0], [0], [1], [0, 0, 1, 1], [], []>} : vector<16x32xbf16>, vector<32x96xbf16>, vector<16x96xf32> -> vector<16x96xf32>
    %7 = arith.addf %3, %6 : vector<16x96xf32>
    %c0_6 = arith.constant 0 : index
    %c0_7 = arith.constant 0 : index
    %8 = vector.load %arg7[%c0_6, %c0_7] : memref<16x96xf32, #tpu.memory_space<vmem>>, vector<16x96xf32>
    tpu.vector_store %arg7[%c0_6, %c0_7], %7 {strides = array<i32>} : memref<16x96xf32, #tpu.memory_space<vmem>>, vector<16x96xf32>,
    %c0_i32_8 = arith.constant 0 : i32
    %9 = arith.cmpi eq, %arg2, %c0_i32_8 : i32
    %10 = arith.extui %9 : i1 to i32
    %c0_i32_9 = arith.constant 0 : i32
    %11 = arith.cmpi ne, %10, %c0_i32_9 : i32
    scf.if %11 {
      %c0_10 = arith.constant 0 : index
      %c0_11 = arith.constant 0 : index
      %12 = vector.load %arg7[%c0_10, %c0_11] : memref<16x96xf32, #tpu.memory_space<vmem>>, vector<16x96xf32>
      %c0_12 = arith.constant 0 : index
      %c0_13 = arith.constant 0 : index
      %13 = vector.load %arg5[%c0_12, %c0_13] : memref<1x96xf32, #tpu.memory_space<vmem>>, vector<1x96xf32>
      %14 = vector.broadcast %13 : vector<1x96xf32> to vector<16x96xf32>
      %15 = arith.addf %12, %14 : vector<16x96xf32>
      %16 = arith.truncf %15 : vector<16x96xf32> to vector<16x96xbf16>
      %c0_14 = arith.constant 0 : index
      %c0_15 = arith.constant 0 : index
      %17 = vector.load %arg6[%c0_14, %c0_15] : memref<16x96xbf16, #tpu.memory_space<vmem>>, vector<16x96xbf16>
      tpu.vector_store %arg6[%c0_14, %c0_15], %16 {strides = array<i32>} : memref<16x96xbf16, #tpu.memory_space<vmem>>, vector<16x96xbf16>,
    } else {
    }
    return
  }
  func.func @transform_0(%arg0: i32, %arg1: i32, %arg2: i32) -> (i32, i32) {
    %c0_i32 = arith.constant 0 : i32
    return %arg0, %arg2 : i32, i32
  }
  func.func @transform_1(%arg0: i32, %arg1: i32, %arg2: i32) -> (i32, i32) {
    %c0_i32 = arith.constant 0 : i32
    return %arg2, %arg1 : i32, i32
  }
  func.func @transform_2(%arg0: i32, %arg1: i32, %arg2: i32) -> (i32, i32) {
    %c0_i32 = arith.constant 0 : i32
    %c0_i32_0 = arith.constant 0 : i32
    return %c0_i32, %arg1 : i32, i32
  }
  func.func @transform_3(%arg0: i32, %arg1: i32, %arg2: i32) -> (i32, i32) {
    %c0_i32 = arith.constant 0 : i32
    return %arg0, %arg1 : i32, i32
  }
}

module attributes {stable_mosaic.version = 11 : i64} {
  func.func @_attn_kernel(%arg0: i32, %arg1: i32, %arg2: i32, %arg3: memref<1x1x8x8xbf16, #tpu.memory_space<vmem>>, %arg4: memref<1x1x8x8xbf16, #tpu.memory_space<vmem>>, %arg5: memref<1x1x8x8xbf16, #tpu.memory_space<vmem>>, %arg6: memref<1x1x8x8xbf16, #tpu.memory_space<vmem>>) attributes {dimension_semantics = [#tpu.dimension_semantics<parallel>, #tpu.dimension_semantics<parallel>, #tpu.dimension_semantics<parallel>], iteration_bounds = array<i64: 2, 4, 1>, scalar_prefetch = 0 : i64, scratch_operands = 0 : i64, tpu.core_type = #tpu.core_type<tc>, window_params = [{transform_indices = @transform_0, window_bounds = array<i64: 1, 1, 8, 8>}, {transform_indices = @transform_1, window_bounds = array<i64: 1, 1, 8, 8>}, {transform_indices = @transform_2, window_bounds = array<i64: 1, 1, 8, 8>}, {transform_indices = @transform_3, window_bounds = array<i64: 1, 1, 8, 8>}]} {
    %c0 = arith.constant 0 : index
    %c0_0 = arith.constant 0 : index
    %c0_1 = arith.constant 0 : index
    %c0_2 = arith.constant 0 : index
    %0 = vector.load %arg3[%c0, %c0_0, %c0_1, %c0_2] : memref<1x1x8x8xbf16, #tpu.memory_space<vmem>>, vector<1x1x8x8xbf16>
    %1 = vector.shape_cast %0 : vector<1x1x8x8xbf16> to vector<8x8xbf16>
    %c0_3 = arith.constant 0 : index
    %c0_4 = arith.constant 0 : index
    %c0_5 = arith.constant 0 : index
    %c0_6 = arith.constant 0 : index
    %2 = vector.load %arg4[%c0_3, %c0_4, %c0_5, %c0_6] : memref<1x1x8x8xbf16, #tpu.memory_space<vmem>>, vector<1x1x8x8xbf16>
    %3 = vector.shape_cast %2 : vector<1x1x8x8xbf16> to vector<8x8xbf16>
    %c0_7 = arith.constant 0 : index
    %c0_8 = arith.constant 0 : index
    %c0_9 = arith.constant 0 : index
    %c0_10 = arith.constant 0 : index
    %4 = vector.load %arg5[%c0_7, %c0_8, %c0_9, %c0_10] : memref<1x1x8x8xbf16, #tpu.memory_space<vmem>>, vector<1x1x8x8xbf16>
    %5 = vector.shape_cast %4 : vector<1x1x8x8xbf16> to vector<8x8xbf16>
    %cst = arith.constant dense<0.000000e+00> : vector<8x8xf32>
    %6 = tpu.matmul %1, %3, %cst {dimension_numbers = #tpu.dot_dimension_numbers<[1], [1], [0], [0], [0, 0, 1, 0], [], []>} : vector<8x8xbf16>, vector<8x8xbf16>, vector<8x8xf32> -> vector<8x8xf32>
    %cst_11 = arith.constant 0.353553385 : f32
    %7 = vector.broadcast %cst_11 : f32 to vector<8x8xf32>
    %8 = arith.mulf %6, %7 : vector<8x8xf32>
    %cst_12 = arith.constant dense<0xFF800000> : vector<8xf32>
    %9 = vector.multi_reduction <maximumf>, %8, %cst_12 [1] : vector<8x8xf32> to vector<8xf32>
    %10 = vector.shape_cast %9 : vector<8xf32> to vector<8x1xf32>
    %11 = vector.broadcast %10 : vector<8x1xf32> to vector<8x8xf32>
    %12 = arith.subf %8, %11 : vector<8x8xf32>
    %13 = math.exp %12 : vector<8x8xf32>
    %cst_13 = arith.constant dense<0.000000e+00> : vector<8xf32>
    %14 = vector.multi_reduction <add>, %13, %cst_13 [1] : vector<8x8xf32> to vector<8xf32>
    %15 = vector.shape_cast %14 : vector<8xf32> to vector<8x1xf32>
    %16 = tpu.reciprocal %15 {approx = true} : vector<8x1xf32> -> vector<8x1xf32>
    %17 = vector.broadcast %16 : vector<8x1xf32> to vector<8x8xf32>
    %18 = arith.mulf %13, %17 : vector<8x8xf32>
    %19 = arith.truncf %18 : vector<8x8xf32> to vector<8x8xbf16>
    %cst_14 = arith.constant dense<0.000000e+00> : vector<8x8xf32>
    %20 = tpu.matmul %19, %5, %cst_14 {dimension_numbers = #tpu.dot_dimension_numbers<[1], [0], [0], [1], [0, 0, 1, 1], [], []>} : vector<8x8xbf16>, vector<8x8xbf16>, vector<8x8xf32> -> vector<8x8xf32>
    %21 = arith.truncf %20 : vector<8x8xf32> to vector<8x8xbf16>
    %c0_15 = arith.constant 0 : index
    %c0_16 = arith.constant 0 : index
    %c0_17 = arith.constant 0 : index
    %c0_18 = arith.constant 0 : index
    %22 = vector.load %arg6[%c0_15, %c0_16, %c0_17, %c0_18] : memref<1x1x8x8xbf16, #tpu.memory_space<vmem>>, vector<1x1x8x8xbf16>
    %23 = vector.shape_cast %22 : vector<1x1x8x8xbf16> to vector<8x8xbf16>
    %24 = vector.shape_cast %21 : vector<8x8xbf16> to vector<1x1x8x8xbf16>
    tpu.vector_store %arg6[%c0_15, %c0_16, %c0_17, %c0_18], %24 {strides = array<i32>} : memref<1x1x8x8xbf16, #tpu.memory_space<vmem>>, vector<1x1x8x8xbf16>,
    return
  }
  func.func @transform_0(%arg0: i32, %arg1: i32, %arg2: i32) -> (i32, i32, i32, i32) {
    %c0_i32 = arith.constant 0 : i32
    %c0_i32_0 = arith.constant 0 : i32
    return %arg0, %arg1, %arg2, %c0_i32 : i32, i32, i32, i32
  }
  func.func @transform_1(%arg0: i32, %arg1: i32, %arg2: i32) -> (i32, i32, i32, i32) {
    %c0_i32 = arith.constant 0 : i32
    %c0_i32_0 = arith.constant 0 : i32
    %c0_i32_1 = arith.constant 0 : i32
    return %arg0, %arg1, %c0_i32, %c0_i32_0 : i32, i32, i32, i32
  }
  func.func @transform_2(%arg0: i32, %arg1: i32, %arg2: i32) -> (i32, i32, i32, i32) {
    %c0_i32 = arith.constant 0 : i32
    %c0_i32_0 = arith.constant 0 : i32
    %c0_i32_1 = arith.constant 0 : i32
    return %arg0, %arg1, %c0_i32, %c0_i32_0 : i32, i32, i32, i32
  }
  func.func @transform_3(%arg0: i32, %arg1: i32, %arg2: i32) -> (i32, i32, i32, i32) {
    %c0_i32 = arith.constant 0 : i32
    %c0_i32_0 = arith.constant 0 : i32
    return %arg0, %arg1, %arg2, %c0_i32 : i32, i32, i32, i32
  }
}

module attributes {stable_mosaic.version = 11 : i64} {
  func.func @_dense_ln_kernel(%arg0: i32, %arg1: i32, %arg2: memref<16x32xbf16, #tpu.memory_space<vmem>>, %arg3: memref<32x32xbf16, #tpu.memory_space<vmem>>, %arg4: memref<1x32xf32, #tpu.memory_space<vmem>>, %arg5: memref<16x32xbf16, #tpu.memory_space<vmem>>, %arg6: memref<1x32xf32, #tpu.memory_space<vmem>>, %arg7: memref<1x32xf32, #tpu.memory_space<vmem>>, %arg8: memref<16x32xbf16, #tpu.memory_space<vmem>>, %arg9: memref<16x32xf32, #tpu.memory_space<vmem>>) attributes {dimension_semantics = [#tpu.dimension_semantics<parallel>, #tpu.dimension_semantics<arbitrary>], iteration_bounds = array<i64: 1, 1>, scalar_prefetch = 0 : i64, scratch_operands = 1 : i64, tpu.core_type = #tpu.core_type<tc>, window_params = [{transform_indices = @transform_0, window_bounds = array<i64: 16, 32>}, {transform_indices = @transform_1, window_bounds = array<i64: 32, 32>}, {pipeline_mode = #tpu.pipeline_mode<synchronous>, transform_indices = @transform_2, window_bounds = array<i64: 1, 32>}, {transform_indices = @transform_3, window_bounds = array<i64: 16, 32>}, {pipeline_mode = #tpu.pipeline_mode<synchronous>, transform_indices = @transform_4, window_bounds = array<i64: 1, 32>}, {pipeline_mode = #tpu.pipeline_mode<synchronous>, transform_indices = @transform_5, window_bounds = array<i64: 1, 32>}, {transform_indices = @transform_6, window_bounds = array<i64: 16, 32>}]} {
    %c0_i32 = arith.constant 0 : i32
    %0 = arith.cmpi eq, %arg1, %c0_i32 : i32
    %1 = arith.extui %0 : i1 to i32
    %c0_i32_0 = arith.constant 0 : i32
    %2 = arith.cmpi ne, %1, %c0_i32_0 : i32
    scf.if %2 {
      %cst_10 = arith.constant 0.000000e+00 : f32
      %12 = vector.broadcast %cst_10 : f32 to vector<16x32xf32>
      %c0_11 = arith.constant 0 : index
      %c0_12 = arith.constant 0 : index
      %13 = vector.load %arg9[%c0_11, %c0_12] : memref<16x32xf32, #tpu.memory_space<vmem>>, vector<16x32xf32>
      tpu.vector_store %arg9[%c0_11, %c0_12], %12 {strides = array<i32>} : memref<16x32xf32, #tpu.memory_space<vmem>>, vector<16x32xf32>,
    } else {
    }
    %c0 = arith.constant 0 : index
    %c0_1 = arith.constant 0 : index
    %3 = vector.load %arg9[%c0, %c0_1] : memref<16x32xf32, #tpu.memory_space<vmem>>, vector<16x32xf32>
    %c0_2 = arith.constant 0 : index
    %c0_3 = arith.constant 0 : index
    %4 = vector.load %arg2[%c0_2, %c0_3] : memref<16x32xbf16, #tpu.memory_space<vmem>>, vector<16x32xbf16>
    %c0_4 = arith.constant 0 : index
    %c0_5 = arith.constant 0 : index
    %5 = vector.load %arg3[%c0_4, %c0_5] : memref<32x32xbf16, #tpu.memory_space<vmem>>, vector<32x32xbf16>
    %cst = arith.constant dense<0.000000e+00> : vector<16x32xf32>
    %6 = tpu.matmul %4, %5, %cst {dimension_numbers = #tpu.dot_dimension_numbers<[1], [0], [0], [1], [0, 0, 1, 1], [], []>} : vector<16x32xbf16>, vector<32x32xbf16>, vector<16x32xf32> -> vector<16x32xf32>
    %7 = arith.addf %3, %6 : vector<16x32xf32>
    %c0_6 = arith.constant 0 : index
    %c0_7 = arith.constant 0 : index
    %8 = vector.load %arg9[%c0_6, %c0_7] : memref<16x32xf32, #tpu.memory_space<vmem>>, vector<16x32xf32>
    tpu.vector_store %arg9[%c0_6, %c0_7], %7 {strides = array<i32>} : memref<16x32xf32, #tpu.memory_space<vmem>>, vector<16x32xf32>,
    %c0_i32_8 = arith.constant 0 : i32
    %9 = arith.cmpi eq, %arg1, %c0_i32_8 : i32
    %10 = arith.extui %9 : i1 to i32
    %c0_i32_9 = arith.constant 0 : i32
    %11 = arith.cmpi ne, %10, %c0_i32_9 : i32
    scf.if %11 {
      %c0_10 = arith.constant 0 : index
      %c0_11 = arith.constant 0 : index
      %12 = vector.load %arg9[%c0_10, %c0_11] : memref<16x32xf32, #tpu.memory_space<vmem>>, vector<16x32xf32>
      %c0_12 = arith.constant 0 : index
      %c0_13 = arith.constant 0 : index
      %13 = vector.load %arg4[%c0_12, %c0_13] : memref<1x32xf32, #tpu.memory_space<vmem>>, vector<1x32xf32>
      %14 = vector.broadcast %13 : vector<1x32xf32> to vector<16x32xf32>
      %15 = arith.addf %12, %14 : vector<16x32xf32>
      %c0_14 = arith.constant 0 : index
      %c0_15 = arith.constant 0 : index
      %16 = vector.load %arg5[%c0_14, %c0_15] : memref<16x32xbf16, #tpu.memory_space<vmem>>, vector<16x32xbf16>
      %17 = arith.extf %16 : vector<16x32xbf16> to vector<16x32xf32>
      %18 = arith.addf %15, %17 : vector<16x32xf32>
      %cst_16 = arith.constant dense<0.000000e+00> : vector<16xf32>
      %19 = vector.multi_reduction <add>, %18, %cst_16 [1] : vector<16x32xf32> to vector<16xf32>
      %20 = vector.shape_cast %19 : vector<16xf32> to vector<16x1xf32>
      %cst_17 = arith.constant 3.200000e+01 : f32
      %21 = vector.broadcast %cst_17 : f32 to vector<16x1xf32>
      %22 = arith.divf %20, %21 : vector<16x1xf32>
      %23 = vector.broadcast %22 : vector<16x1xf32> to vector<16x32xf32>
      %24 = arith.subf %18, %23 : vector<16x32xf32>
      %25 = arith.mulf %24, %24 : vector<16x32xf32>
      %cst_18 = arith.constant dense<0.000000e+00> : vector<16xf32>
      %26 = vector.multi_reduction <add>, %25, %cst_18 [1] : vector<16x32xf32> to vector<16xf32>
      %27 = vector.shape_cast %26 : vector<16xf32> to vector<16x1xf32>
      %cst_19 = arith.constant 3.200000e+01 : f32
      %28 = vector.broadcast %cst_19 : f32 to vector<16x1xf32>
      %29 = arith.divf %27, %28 : vector<16x1xf32>
      %cst_20 = arith.constant 9.99999996E-13 : f32
      %30 = vector.broadcast %cst_20 : f32 to vector<16x1xf32>
      %31 = arith.addf %29, %30 : vector<16x1xf32>
      %32 = math.rsqrt %31 : vector<16x1xf32>
      %33 = vector.broadcast %32 : vector<16x1xf32> to vector<16x32xf32>
      %34 = arith.mulf %24, %33 : vector<16x32xf32>
      %c0_21 = arith.constant 0 : index
      %c0_22 = arith.constant 0 : index
      %35 = vector.load %arg6[%c0_21, %c0_22] : memref<1x32xf32, #tpu.memory_space<vmem>>, vector<1x32xf32>
      %36 = vector.broadcast %35 : vector<1x32xf32> to vector<16x32xf32>
      %37 = arith.mulf %34, %36 : vector<16x32xf32>
      %c0_23 = arith.constant 0 : index
      %c0_24 = arith.constant 0 : index
      %38 = vector.load %arg7[%c0_23, %c0_24] : memref<1x32xf32, #tpu.memory_space<vmem>>, vector<1x32xf32>
      %39 = vector.broadcast %38 : vector<1x32xf32> to vector<16x32xf32>
      %40 = arith.addf %37, %39 : vector<16x32xf32>
      %41 = arith.truncf %40 : vector<16x32xf32> to vector<16x32xbf16>
      %c0_25 = arith.constant 0 : index
      %c0_26 = arith.constant 0 : index
      %42 = vector.load %arg8[%c0_25, %c0_26] : memref<16x32xbf16, #tpu.memory_space<vmem>>, vector<16x32xbf16>
      tpu.vector_store %arg8[%c0_25, %c0_26], %41 {strides = array<i32>} : memref<16x32xbf16, #tpu.memory_space<vmem>>, vector<16x32xbf16>,
    } else {
    }
    return
  }
  func.func @transform_0(%arg0: i32, %arg1: i32) -> (i32, i32) {
    %c0_i32 = arith.constant 0 : i32
    return %arg0, %arg1 : i32, i32
  }
  func.func @transform_1(%arg0: i32, %arg1: i32) -> (i32, i32) {
    %c0_i32 = arith.constant 0 : i32
    %c0_i32_0 = arith.constant 0 : i32
    return %arg1, %c0_i32 : i32, i32
  }
  func.func @transform_2(%arg0: i32, %arg1: i32) -> (i32, i32) {
    %c0_i32 = arith.constant 0 : i32
    %c0_i32_0 = arith.constant 0 : i32
    %c0_i32_1 = arith.constant 0 : i32
    return %c0_i32, %c0_i32_0 : i32, i32
  }
  func.func @transform_3(%arg0: i32, %arg1: i32) -> (i32, i32) {
    %c0_i32 = arith.constant 0 : i32
    %c0_i32_0 = arith.constant 0 : i32
    return %arg0, %c0_i32 : i32, i32
  }
  func.func @transform_4(%arg0: i32, %arg1: i32) -> (i32, i32) {
    %c0_i32 = arith.constant 0 : i32
    %c0_i32_0 = arith.constant 0 : i32
    %c0_i32_1 = arith.constant 0 : i32
    return %c0_i32, %c0_i32_0 : i32, i32
  }
  func.func @transform_5(%arg0: i32, %arg1: i32) -> (i32, i32) {
    %c0_i32 = arith.constant 0 : i32
    %c0_i32_0 = arith.constant 0 : i32
    %c0_i32_1 = arith.constant 0 : i32
    return %c0_i32, %c0_i32_0 : i32, i32
  }
  func.func @transform_6(%arg0: i32, %arg1: i32) -> (i32, i32) {
    %c0_i32 = arith.constant 0 : i32
    %c0_i32_0 = arith.constant 0 : i32
    return %arg0, %c0_i32 : i32, i32
  }
}

module attributes {stable_mosaic.version = 11 : i64} {
  func.func @_dense_bias_kernel(%arg0: i32, %arg1: i32, %arg2: i32, %arg3: memref<16x32xbf16, #tpu.memory_space<vmem>>, %arg4: memref<32x64xbf16, #tpu.memory_space<vmem>>, %arg5: memref<1x64xf32, #tpu.memory_space<vmem>>, %arg6: memref<16x64xbf16, #tpu.memory_space<vmem>>, %arg7: memref<16x64xf32, #tpu.memory_space<vmem>>) attributes {dimension_semantics = [#tpu.dimension_semantics<parallel>, #tpu.dimension_semantics<parallel>, #tpu.dimension_semantics<arbitrary>], iteration_bounds = array<i64: 1, 1, 1>, scalar_prefetch = 0 : i64, scratch_operands = 1 : i64, tpu.core_type = #tpu.core_type<tc>, window_params = [{transform_indices = @transform_0, window_bounds = array<i64: 16, 32>}, {transform_indices = @transform_1, window_bounds = array<i64: 32, 64>}, {transform_indices = @transform_2, window_bounds = array<i64: 1, 64>}, {transform_indices = @transform_3, window_bounds = array<i64: 16, 64>}]} {
    %c0_i32 = arith.constant 0 : i32
    %0 = arith.cmpi eq, %arg2, %c0_i32 : i32
    %1 = arith.extui %0 : i1 to i32
    %c0_i32_0 = arith.constant 0 : i32
    %2 = arith.cmpi ne, %1, %c0_i32_0 : i32
    scf.if %2 {
      %cst_10 = arith.constant 0.000000e+00 : f32
      %12 = vector.broadcast %cst_10 : f32 to vector<16x64xf32>
      %c0_11 = arith.constant 0 : index
      %c0_12 = arith.constant 0 : index
      %13 = vector.load %arg7[%c0_11, %c0_12] : memref<16x64xf32, #tpu.memory_space<vmem>>, vector<16x64xf32>
      tpu.vector_store %arg7[%c0_11, %c0_12], %12 {strides = array<i32>} : memref<16x64xf32, #tpu.memory_space<vmem>>, vector<16x64xf32>,
    } else {
    }
    %c0 = arith.constant 0 : index
    %c0_1 = arith.constant 0 : index
    %3 = vector.load %arg7[%c0, %c0_1] : memref<16x64xf32, #tpu.memory_space<vmem>>, vector<16x64xf32>
    %c0_2 = arith.constant 0 : index
    %c0_3 = arith.constant 0 : index
    %4 = vector.load %arg3[%c0_2, %c0_3] : memref<16x32xbf16, #tpu.memory_space<vmem>>, vector<16x32xbf16>
    %c0_4 = arith.constant 0 : index
    %c0_5 = arith.constant 0 : index
    %5 = vector.load %arg4[%c0_4, %c0_5] : memref<32x64xbf16, #tpu.memory_space<vmem>>, vector<32x64xbf16>
    %cst = arith.constant dense<0.000000e+00> : vector<16x64xf32>
    %6 = tpu.matmul %4, %5, %cst {dimension_numbers = #tpu.dot_dimension_numbers<[1], [0], [0], [1], [0, 0, 1, 1], [], []>} : vector<16x32xbf16>, vector<32x64xbf16>, vector<16x64xf32> -> vector<16x64xf32>
    %7 = arith.addf %3, %6 : vector<16x64xf32>
    %c0_6 = arith.constant 0 : index
    %c0_7 = arith.constant 0 : index
    %8 = vector.load %arg7[%c0_6, %c0_7] : memref<16x64xf32, #tpu.memory_space<vmem>>, vector<16x64xf32>
    tpu.vector_store %arg7[%c0_6, %c0_7], %7 {strides = array<i32>} : memref<16x64xf32, #tpu.memory_space<vmem>>, vector<16x64xf32>,
    %c0_i32_8 = arith.constant 0 : i32
    %9 = arith.cmpi eq, %arg2, %c0_i32_8 : i32
    %10 = arith.extui %9 : i1 to i32
    %c0_i32_9 = arith.constant 0 : i32
    %11 = arith.cmpi ne, %10, %c0_i32_9 : i32
    scf.if %11 {
      %c0_10 = arith.constant 0 : index
      %c0_11 = arith.constant 0 : index
      %12 = vector.load %arg7[%c0_10, %c0_11] : memref<16x64xf32, #tpu.memory_space<vmem>>, vector<16x64xf32>
      %c0_12 = arith.constant 0 : index
      %c0_13 = arith.constant 0 : index
      %13 = vector.load %arg5[%c0_12, %c0_13] : memref<1x64xf32, #tpu.memory_space<vmem>>, vector<1x64xf32>
      %14 = vector.broadcast %13 : vector<1x64xf32> to vector<16x64xf32>
      %15 = arith.addf %12, %14 : vector<16x64xf32>
      %16 = arith.mulf %15, %15 : vector<16x64xf32>
      %17 = arith.mulf %15, %16 : vector<16x64xf32>
      %cst_14 = arith.constant 4.471500e-02 : f32
      %18 = vector.broadcast %cst_14 : f32 to vector<16x64xf32>
      %19 = arith.mulf %18, %17 : vector<16x64xf32>
      %20 = arith.addf %15, %19 : vector<16x64xf32>
      %cst_15 = arith.constant 0.797884583 : f32
      %21 = vector.broadcast %cst_15 : f32 to vector<16x64xf32>
      %22 = arith.mulf %21, %20 : vector<16x64xf32>
      %23 = math.tanh %22 : vector<16x64xf32>
      %cst_16 = arith.constant 1.000000e+00 : f32
      %24 = vector.broadcast %cst_16 : f32 to vector<16x64xf32>
      %25 = arith.addf %24, %23 : vector<16x64xf32>
      %cst_17 = arith.constant 5.000000e-01 : f32
      %26 = vector.broadcast %cst_17 : f32 to vector<16x64xf32>
      %27 = arith.mulf %26, %25 : vector<16x64xf32>
      %28 = arith.mulf %15, %27 : vector<16x64xf32>
      %29 = arith.truncf %28 : vector<16x64xf32> to vector<16x64xbf16>
      %c0_18 = arith.constant 0 : index
      %c0_19 = arith.constant 0 : index
      %30 = vector.load %arg6[%c0_18, %c0_19] : memref<16x64xbf16, #tpu.memory_space<vmem>>, vector<16x64xbf16>
      tpu.vector_store %arg6[%c0_18, %c0_19], %29 {strides = array<i32>} : memref<16x64xbf16, #tpu.memory_space<vmem>>, vector<16x64xbf16>,
    } else {
    }
    return
  }
  func.func @transform_0(%arg0: i32, %arg1: i32, %arg2: i32) -> (i32, i32) {
    %c0_i32 = arith.constant 0 : i32
    return %arg0, %arg2 : i32, i32
  }
  func.func @transform_1(%arg0: i32, %arg1: i32, %arg2: i32) -> (i32, i32) {
    %c0_i32 = arith.constant 0 : i32
    return %arg2, %arg1 : i32, i32
  }
  func.func @transform_2(%arg0: i32, %arg1: i32, %arg2: i32) -> (i32, i32) {
    %c0_i32 = arith.constant 0 : i32
    %c0_i32_0 = arith.constant 0 : i32
    return %c0_i32, %arg1 : i32, i32
  }
  func.func @transform_3(%arg0: i32, %arg1: i32, %arg2: i32) -> (i32, i32) {
    %c0_i32 = arith.constant 0 : i32
    return %arg0, %arg1 : i32, i32
  }
}

module attributes {stable_mosaic.version = 11 : i64} {
  func.func @_dense_ln_kernel(%arg0: i32, %arg1: i32, %arg2: memref<16x64xbf16, #tpu.memory_space<vmem>>, %arg3: memref<64x32xbf16, #tpu.memory_space<vmem>>, %arg4: memref<1x32xf32, #tpu.memory_space<vmem>>, %arg5: memref<16x32xbf16, #tpu.memory_space<vmem>>, %arg6: memref<1x32xf32, #tpu.memory_space<vmem>>, %arg7: memref<1x32xf32, #tpu.memory_space<vmem>>, %arg8: memref<16x32xbf16, #tpu.memory_space<vmem>>, %arg9: memref<16x32xf32, #tpu.memory_space<vmem>>) attributes {dimension_semantics = [#tpu.dimension_semantics<parallel>, #tpu.dimension_semantics<arbitrary>], iteration_bounds = array<i64: 1, 1>, scalar_prefetch = 0 : i64, scratch_operands = 1 : i64, tpu.core_type = #tpu.core_type<tc>, window_params = [{transform_indices = @transform_0, window_bounds = array<i64: 16, 64>}, {transform_indices = @transform_1, window_bounds = array<i64: 64, 32>}, {pipeline_mode = #tpu.pipeline_mode<synchronous>, transform_indices = @transform_2, window_bounds = array<i64: 1, 32>}, {transform_indices = @transform_3, window_bounds = array<i64: 16, 32>}, {pipeline_mode = #tpu.pipeline_mode<synchronous>, transform_indices = @transform_4, window_bounds = array<i64: 1, 32>}, {pipeline_mode = #tpu.pipeline_mode<synchronous>, transform_indices = @transform_5, window_bounds = array<i64: 1, 32>}, {transform_indices = @transform_6, window_bounds = array<i64: 16, 32>}]} {
    %c0_i32 = arith.constant 0 : i32
    %0 = arith.cmpi eq, %arg1, %c0_i32 : i32
    %1 = arith.extui %0 : i1 to i32
    %c0_i32_0 = arith.constant 0 : i32
    %2 = arith.cmpi ne, %1, %c0_i32_0 : i32
    scf.if %2 {
      %cst_10 = arith.constant 0.000000e+00 : f32
      %12 = vector.broadcast %cst_10 : f32 to vector<16x32xf32>
      %c0_11 = arith.constant 0 : index
      %c0_12 = arith.constant 0 : index
      %13 = vector.load %arg9[%c0_11, %c0_12] : memref<16x32xf32, #tpu.memory_space<vmem>>, vector<16x32xf32>
      tpu.vector_store %arg9[%c0_11, %c0_12], %12 {strides = array<i32>} : memref<16x32xf32, #tpu.memory_space<vmem>>, vector<16x32xf32>,
    } else {
    }
    %c0 = arith.constant 0 : index
    %c0_1 = arith.constant 0 : index
    %3 = vector.load %arg9[%c0, %c0_1] : memref<16x32xf32, #tpu.memory_space<vmem>>, vector<16x32xf32>
    %c0_2 = arith.constant 0 : index
    %c0_3 = arith.constant 0 : index
    %4 = vector.load %arg2[%c0_2, %c0_3] : memref<16x64xbf16, #tpu.memory_space<vmem>>, vector<16x64xbf16>
    %c0_4 = arith.constant 0 : index
    %c0_5 = arith.constant 0 : index
    %5 = vector.load %arg3[%c0_4, %c0_5] : memref<64x32xbf16, #tpu.memory_space<vmem>>, vector<64x32xbf16>
    %cst = arith.constant dense<0.000000e+00> : vector<16x32xf32>
    %6 = tpu.matmul %4, %5, %cst {dimension_numbers = #tpu.dot_dimension_numbers<[1], [0], [0], [1], [0, 0, 1, 1], [], []>} : vector<16x64xbf16>, vector<64x32xbf16>, vector<16x32xf32> -> vector<16x32xf32>
    %7 = arith.addf %3, %6 : vector<16x32xf32>
    %c0_6 = arith.constant 0 : index
    %c0_7 = arith.constant 0 : index
    %8 = vector.load %arg9[%c0_6, %c0_7] : memref<16x32xf32, #tpu.memory_space<vmem>>, vector<16x32xf32>
    tpu.vector_store %arg9[%c0_6, %c0_7], %7 {strides = array<i32>} : memref<16x32xf32, #tpu.memory_space<vmem>>, vector<16x32xf32>,
    %c0_i32_8 = arith.constant 0 : i32
    %9 = arith.cmpi eq, %arg1, %c0_i32_8 : i32
    %10 = arith.extui %9 : i1 to i32
    %c0_i32_9 = arith.constant 0 : i32
    %11 = arith.cmpi ne, %10, %c0_i32_9 : i32
    scf.if %11 {
      %c0_10 = arith.constant 0 : index
      %c0_11 = arith.constant 0 : index
      %12 = vector.load %arg9[%c0_10, %c0_11] : memref<16x32xf32, #tpu.memory_space<vmem>>, vector<16x32xf32>
      %c0_12 = arith.constant 0 : index
      %c0_13 = arith.constant 0 : index
      %13 = vector.load %arg4[%c0_12, %c0_13] : memref<1x32xf32, #tpu.memory_space<vmem>>, vector<1x32xf32>
      %14 = vector.broadcast %13 : vector<1x32xf32> to vector<16x32xf32>
      %15 = arith.addf %12, %14 : vector<16x32xf32>
      %c0_14 = arith.constant 0 : index
      %c0_15 = arith.constant 0 : index
      %16 = vector.load %arg5[%c0_14, %c0_15] : memref<16x32xbf16, #tpu.memory_space<vmem>>, vector<16x32xbf16>
      %17 = arith.extf %16 : vector<16x32xbf16> to vector<16x32xf32>
      %18 = arith.addf %15, %17 : vector<16x32xf32>
      %cst_16 = arith.constant dense<0.000000e+00> : vector<16xf32>
      %19 = vector.multi_reduction <add>, %18, %cst_16 [1] : vector<16x32xf32> to vector<16xf32>
      %20 = vector.shape_cast %19 : vector<16xf32> to vector<16x1xf32>
      %cst_17 = arith.constant 3.200000e+01 : f32
      %21 = vector.broadcast %cst_17 : f32 to vector<16x1xf32>
      %22 = arith.divf %20, %21 : vector<16x1xf32>
      %23 = vector.broadcast %22 : vector<16x1xf32> to vector<16x32xf32>
      %24 = arith.subf %18, %23 : vector<16x32xf32>
      %25 = arith.mulf %24, %24 : vector<16x32xf32>
      %cst_18 = arith.constant dense<0.000000e+00> : vector<16xf32>
      %26 = vector.multi_reduction <add>, %25, %cst_18 [1] : vector<16x32xf32> to vector<16xf32>
      %27 = vector.shape_cast %26 : vector<16xf32> to vector<16x1xf32>
      %cst_19 = arith.constant 3.200000e+01 : f32
      %28 = vector.broadcast %cst_19 : f32 to vector<16x1xf32>
      %29 = arith.divf %27, %28 : vector<16x1xf32>
      %cst_20 = arith.constant 9.99999996E-13 : f32
      %30 = vector.broadcast %cst_20 : f32 to vector<16x1xf32>
      %31 = arith.addf %29, %30 : vector<16x1xf32>
      %32 = math.rsqrt %31 : vector<16x1xf32>
      %33 = vector.broadcast %32 : vector<16x1xf32> to vector<16x32xf32>
      %34 = arith.mulf %24, %33 : vector<16x32xf32>
      %c0_21 = arith.constant 0 : index
      %c0_22 = arith.constant 0 : index
      %35 = vector.load %arg6[%c0_21, %c0_22] : memref<1x32xf32, #tpu.memory_space<vmem>>, vector<1x32xf32>
      %36 = vector.broadcast %35 : vector<1x32xf32> to vector<16x32xf32>
      %37 = arith.mulf %34, %36 : vector<16x32xf32>
      %c0_23 = arith.constant 0 : index
      %c0_24 = arith.constant 0 : index
      %38 = vector.load %arg7[%c0_23, %c0_24] : memref<1x32xf32, #tpu.memory_space<vmem>>, vector<1x32xf32>
      %39 = vector.broadcast %38 : vector<1x32xf32> to vector<16x32xf32>
      %40 = arith.addf %37, %39 : vector<16x32xf32>
      %41 = arith.truncf %40 : vector<16x32xf32> to vector<16x32xbf16>
      %c0_25 = arith.constant 0 : index
      %c0_26 = arith.constant 0 : index
      %42 = vector.load %arg8[%c0_25, %c0_26] : memref<16x32xbf16, #tpu.memory_space<vmem>>, vector<16x32xbf16>
      tpu.vector_store %arg8[%c0_25, %c0_26], %41 {strides = array<i32>} : memref<16x32xbf16, #tpu.memory_space<vmem>>, vector<16x32xbf16>,
    } else {
    }
    return
  }
  func.func @transform_0(%arg0: i32, %arg1: i32) -> (i32, i32) {
    %c0_i32 = arith.constant 0 : i32
    return %arg0, %arg1 : i32, i32
  }
  func.func @transform_1(%arg0: i32, %arg1: i32) -> (i32, i32) {
    %c0_i32 = arith.constant 0 : i32
    %c0_i32_0 = arith.constant 0 : i32
    return %arg1, %c0_i32 : i32, i32
  }
  func.func @transform_2(%arg0: i32, %arg1: i32) -> (i32, i32) {
    %c0_i32 = arith.constant 0 : i32
    %c0_i32_0 = arith.constant 0 : i32
    %c0_i32_1 = arith.constant 0 : i32
    return %c0_i32, %c0_i32_0 : i32, i32
  }
  func.func @transform_3(%arg0: i32, %arg1: i32) -> (i32, i32) {
    %c0_i32 = arith.constant 0 : i32
    %c0_i32_0 = arith.constant 0 : i32
    return %arg0, %c0_i32 : i32, i32
  }
  func.func @transform_4(%arg0: i32, %arg1: i32) -> (i32, i32) {
    %c0_i32 = arith.constant 0 : i32
    %c0_i32_0 = arith.constant 0 : i32
    %c0_i32_1 = arith.constant 0 : i32
    return %c0_i32, %c0_i32_0 : i32, i32
  }
  func.func @transform_5(%arg0: i32, %arg1: i32) -> (i32, i32) {
    %c0_i32 = arith.constant 0 : i32
    %c0_i32_0 = arith.constant 0 : i32
    %c0_i32_1 = arith.constant 0 : i32
    return %c0_i32, %c0_i32_0 : i32, i32
  }
  func.func @transform_6(%arg0: i32, %arg1: i32) -> (i32, i32) {
    %c0_i32 = arith.constant 0 : i32
    %c0_i32_0 = arith.constant 0 : i32
    return %arg0, %c0_i32 : i32, i32
  }
}

module attributes {stable_mosaic.version = 11 : i64} {
  func.func @_dense_ln_kernel(%arg0: i32, %arg1: i32, %arg2: memref<16x64xbf16, #tpu.memory_space<vmem>>, %arg3: memref<64x32xbf16, #tpu.memory_space<vmem>>, %arg4: memref<1x32xf32, #tpu.memory_space<vmem>>, %arg5: memref<16x32xbf16, #tpu.memory_space<vmem>>, %arg6: memref<1x32xf32, #tpu.memory_space<vmem>>, %arg7: memref<1x32xf32, #tpu.memory_space<vmem>>, %arg8: memref<16x32xf32, #tpu.memory_space<vmem>>, %arg9: memref<16x32xf32, #tpu.memory_space<vmem>>) attributes {dimension_semantics = [#tpu.dimension_semantics<parallel>, #tpu.dimension_semantics<arbitrary>], iteration_bounds = array<i64: 1, 1>, scalar_prefetch = 0 : i64, scratch_operands = 1 : i64, tpu.core_type = #tpu.core_type<tc>, window_params = [{transform_indices = @transform_0, window_bounds = array<i64: 16, 64>}, {transform_indices = @transform_1, window_bounds = array<i64: 64, 32>}, {pipeline_mode = #tpu.pipeline_mode<synchronous>, transform_indices = @transform_2, window_bounds = array<i64: 1, 32>}, {transform_indices = @transform_3, window_bounds = array<i64: 16, 32>}, {pipeline_mode = #tpu.pipeline_mode<synchronous>, transform_indices = @transform_4, window_bounds = array<i64: 1, 32>}, {pipeline_mode = #tpu.pipeline_mode<synchronous>, transform_indices = @transform_5, window_bounds = array<i64: 1, 32>}, {transform_indices = @transform_6, window_bounds = array<i64: 16, 32>}]} {
    %c0_i32 = arith.constant 0 : i32
    %0 = arith.cmpi eq, %arg1, %c0_i32 : i32
    %1 = arith.extui %0 : i1 to i32
    %c0_i32_0 = arith.constant 0 : i32
    %2 = arith.cmpi ne, %1, %c0_i32_0 : i32
    scf.if %2 {
      %cst_10 = arith.constant 0.000000e+00 : f32
      %12 = vector.broadcast %cst_10 : f32 to vector<16x32xf32>
      %c0_11 = arith.constant 0 : index
      %c0_12 = arith.constant 0 : index
      %13 = vector.load %arg9[%c0_11, %c0_12] : memref<16x32xf32, #tpu.memory_space<vmem>>, vector<16x32xf32>
      tpu.vector_store %arg9[%c0_11, %c0_12], %12 {strides = array<i32>} : memref<16x32xf32, #tpu.memory_space<vmem>>, vector<16x32xf32>,
    } else {
    }
    %c0 = arith.constant 0 : index
    %c0_1 = arith.constant 0 : index
    %3 = vector.load %arg9[%c0, %c0_1] : memref<16x32xf32, #tpu.memory_space<vmem>>, vector<16x32xf32>
    %c0_2 = arith.constant 0 : index
    %c0_3 = arith.constant 0 : index
    %4 = vector.load %arg2[%c0_2, %c0_3] : memref<16x64xbf16, #tpu.memory_space<vmem>>, vector<16x64xbf16>
    %c0_4 = arith.constant 0 : index
    %c0_5 = arith.constant 0 : index
    %5 = vector.load %arg3[%c0_4, %c0_5] : memref<64x32xbf16, #tpu.memory_space<vmem>>, vector<64x32xbf16>
    %cst = arith.constant dense<0.000000e+00> : vector<16x32xf32>
    %6 = tpu.matmul %4, %5, %cst {dimension_numbers = #tpu.dot_dimension_numbers<[1], [0], [0], [1], [0, 0, 1, 1], [], []>} : vector<16x64xbf16>, vector<64x32xbf16>, vector<16x32xf32> -> vector<16x32xf32>
    %7 = arith.addf %3, %6 : vector<16x32xf32>
    %c0_6 = arith.constant 0 : index
    %c0_7 = arith.constant 0 : index
    %8 = vector.load %arg9[%c0_6, %c0_7] : memref<16x32xf32, #tpu.memory_space<vmem>>, vector<16x32xf32>
    tpu.vector_store %arg9[%c0_6, %c0_7], %7 {strides = array<i32>} : memref<16x32xf32, #tpu.memory_space<vmem>>, vector<16x32xf32>,
    %c0_i32_8 = arith.constant 0 : i32
    %9 = arith.cmpi eq, %arg1, %c0_i32_8 : i32
    %10 = arith.extui %9 : i1 to i32
    %c0_i32_9 = arith.constant 0 : i32
    %11 = arith.cmpi ne, %10, %c0_i32_9 : i32
    scf.if %11 {
      %c0_10 = arith.constant 0 : index
      %c0_11 = arith.constant 0 : index
      %12 = vector.load %arg9[%c0_10, %c0_11] : memref<16x32xf32, #tpu.memory_space<vmem>>, vector<16x32xf32>
      %c0_12 = arith.constant 0 : index
      %c0_13 = arith.constant 0 : index
      %13 = vector.load %arg4[%c0_12, %c0_13] : memref<1x32xf32, #tpu.memory_space<vmem>>, vector<1x32xf32>
      %14 = vector.broadcast %13 : vector<1x32xf32> to vector<16x32xf32>
      %15 = arith.addf %12, %14 : vector<16x32xf32>
      %c0_14 = arith.constant 0 : index
      %c0_15 = arith.constant 0 : index
      %16 = vector.load %arg5[%c0_14, %c0_15] : memref<16x32xbf16, #tpu.memory_space<vmem>>, vector<16x32xbf16>
      %17 = arith.extf %16 : vector<16x32xbf16> to vector<16x32xf32>
      %18 = arith.addf %15, %17 : vector<16x32xf32>
      %cst_16 = arith.constant dense<0.000000e+00> : vector<16xf32>
      %19 = vector.multi_reduction <add>, %18, %cst_16 [1] : vector<16x32xf32> to vector<16xf32>
      %20 = vector.shape_cast %19 : vector<16xf32> to vector<16x1xf32>
      %cst_17 = arith.constant 3.200000e+01 : f32
      %21 = vector.broadcast %cst_17 : f32 to vector<16x1xf32>
      %22 = arith.divf %20, %21 : vector<16x1xf32>
      %23 = vector.broadcast %22 : vector<16x1xf32> to vector<16x32xf32>
      %24 = arith.subf %18, %23 : vector<16x32xf32>
      %25 = arith.mulf %24, %24 : vector<16x32xf32>
      %cst_18 = arith.constant dense<0.000000e+00> : vector<16xf32>
      %26 = vector.multi_reduction <add>, %25, %cst_18 [1] : vector<16x32xf32> to vector<16xf32>
      %27 = vector.shape_cast %26 : vector<16xf32> to vector<16x1xf32>
      %cst_19 = arith.constant 3.200000e+01 : f32
      %28 = vector.broadcast %cst_19 : f32 to vector<16x1xf32>
      %29 = arith.divf %27, %28 : vector<16x1xf32>
      %cst_20 = arith.constant 9.99999996E-13 : f32
      %30 = vector.broadcast %cst_20 : f32 to vector<16x1xf32>
      %31 = arith.addf %29, %30 : vector<16x1xf32>
      %32 = math.rsqrt %31 : vector<16x1xf32>
      %33 = vector.broadcast %32 : vector<16x1xf32> to vector<16x32xf32>
      %34 = arith.mulf %24, %33 : vector<16x32xf32>
      %c0_21 = arith.constant 0 : index
      %c0_22 = arith.constant 0 : index
      %35 = vector.load %arg6[%c0_21, %c0_22] : memref<1x32xf32, #tpu.memory_space<vmem>>, vector<1x32xf32>
      %36 = vector.broadcast %35 : vector<1x32xf32> to vector<16x32xf32>
      %37 = arith.mulf %34, %36 : vector<16x32xf32>
      %c0_23 = arith.constant 0 : index
      %c0_24 = arith.constant 0 : index
      %38 = vector.load %arg7[%c0_23, %c0_24] : memref<1x32xf32, #tpu.memory_space<vmem>>, vector<1x32xf32>
      %39 = vector.broadcast %38 : vector<1x32xf32> to vector<16x32xf32>
      %40 = arith.addf %37, %39 : vector<16x32xf32>
      %c0_25 = arith.constant 0 : index
      %c0_26 = arith.constant 0 : index
      %41 = vector.load %arg8[%c0_25, %c0_26] : memref<16x32xf32, #tpu.memory_space<vmem>>, vector<16x32xf32>
      tpu.vector_store %arg8[%c0_25, %c0_26], %40 {strides = array<i32>} : memref<16x32xf32, #tpu.memory_space<vmem>>, vector<16x32xf32>,
    } else {
    }
    return
  }
  func.func @transform_0(%arg0: i32, %arg1: i32) -> (i32, i32) {
    %c0_i32 = arith.constant 0 : i32
    return %arg0, %arg1 : i32, i32
  }
  func.func @transform_1(%arg0: i32, %arg1: i32) -> (i32, i32) {
    %c0_i32 = arith.constant 0 : i32
    %c0_i32_0 = arith.constant 0 : i32
    return %arg1, %c0_i32 : i32, i32
  }
  func.func @transform_2(%arg0: i32, %arg1: i32) -> (i32, i32) {
    %c0_i32 = arith.constant 0 : i32
    %c0_i32_0 = arith.constant 0 : i32
    %c0_i32_1 = arith.constant 0 : i32
    return %c0_i32, %c0_i32_0 : i32, i32
  }
  func.func @transform_3(%arg0: i32, %arg1: i32) -> (i32, i32) {
    %c0_i32 = arith.constant 0 : i32
    %c0_i32_0 = arith.constant 0 : i32
    return %arg0, %c0_i32 : i32, i32
  }
  func.func @transform_4(%arg0: i32, %arg1: i32) -> (i32, i32) {
    %c0_i32 = arith.constant 0 : i32
    %c0_i32_0 = arith.constant 0 : i32
    %c0_i32_1 = arith.constant 0 : i32
    return %c0_i32, %c0_i32_0 : i32, i32
  }
  func.func @transform_5(%arg0: i32, %arg1: i32) -> (i32, i32) {
    %c0_i32 = arith.constant 0 : i32
    %c0_i32_0 = arith.constant 0 : i32
    %c0_i32_1 = arith.constant 0 : i32
    return %c0_i32, %c0_i32_0 : i32, i32
  }
  func.func @transform_6(%arg0: i32, %arg1: i32) -> (i32, i32) {
    %c0_i32 = arith.constant 0 : i32
    %c0_i32_0 = arith.constant 0 : i32
    return %arg0, %c0_i32 : i32, i32
  }
}

</mosaic_0001>

<bundles_post_ra>
// kernel: text_learnable_encoder_forward.11
= control target key start
LH: loop header
LB: loop body
LE: loop exit
PB: predicated region body
PF: predicated region fallthrough
CT: control target
= control target key end

     0   :  { %vm16_vm0 = vcmask 261120   ;;  %vm70_vm1 = vcmask 257024   ;;  %s129_s0 = inlined_call_operand.vmem [shape: f32[16,32], index: 0, kind: input, shape index: {}]   ;;  %s130_s1 = inlined_call_operand.vmem [shape: f32[1,32], index: 1, kind: input, shape index: {}]   ;;  %s131_s2 = inlined_call_operand.vmem [shape: f32[1,32], index: 2, kind: input, shape index: {}]   ;;  %s132_s3 = inlined_call_operand.vmem [shape: bf16[16,32], index: 3, kind: output, shape index: {}]  }
   0x1   :  { %v14_v0 = vld [vmem:[%s129_s0] sm:$0xff]  ;;  %v15_v1 = vld [vmem:[%s129_s0 + $0x8] sm:$0xff] }
   0x2   :  { %v17_v2 = vsel %vm16_vm0, %v14_v0, 0.0  ;;  %v20_v3 = vsel %vm16_vm0, %v15_v1, 0.0  ;;  %v77_v21 = vld [vmem:[%s130_s1] ss:$0 sm:$0xff] }
   0x3   :  { %18 = vadd.xlane.f32.xlu0 %v17_v2  ;;  %v78_v23 = vld [vmem:[%s131_s2] ss:$0 sm:$0xff] }
   0x7   :  { %21 = vadd.xlane.f32.xlu0 %v20_v3 }
  0x90   :  { %v19_v4 = vpop.xlane.xlu0 %18 }
  0x91   :  { %v24_v5 = vmul.f32 0.03125, %v19_v4 }
  0x93   :  { %v26_v6 = vsub.f32 %v14_v0, %v24_v5 }
  0x94   :  { %v22_v7 = vpop.xlane.xlu0 %21 }
  0x95   :  { %v25_v8 = vmul.f32 0.03125, %v22_v7  ;;  %v28_v9 = vmul.f32 %v26_v6, %v26_v6 }
  0x97   :  { %v27_v10 = vsub.f32 %v15_v1, %v25_v8  ;;  %v30_v11 = vsel %vm16_vm0, %v28_v9, 0.0 }
  0x98   :  { %31 = vadd.xlane.f32.xlu1 %v30_v11 }
  0x99   :  { %v29_v12 = vmul.f32 %v27_v10, %v27_v10 }
  0x9b   :  { %v33_v13 = vsel %vm16_vm0, %v29_v12, 0.0 }
  0x9c   :  { %34 = vadd.xlane.f32.xlu1 %v33_v13 }
 0x125   :  { %v32_v14 = vpop.xlane.xlu1 %31 }
 0x126   :  { %v36_v15 = vmul.f32 0.03125, %v32_v14 }
 0x128   :  { %v38_v16 = vadd.f32 1e-12, %v36_v15 }
 0x129   :  { %v35_v17 = vpop.xlane.xlu1 %34 }
 0x12a   :  { %83 = vrsqrt.f32 %v38_v16  ;;  %v37_v18 = vmul.f32 0.03125, %v35_v17 }
 0x12c   :  { %v39_v19 = vadd.f32 1e-12, %v37_v18 }
 0x12e   :  { %85 = vrsqrt.f32 %v39_v19 }
 0x134   :  { %v84_v20 = vpop.eup %83 }
 0x135   :  { %v42_v22 = vmul.f32 %v84_v20, %v26_v6 }
 0x137   :  { %v51_v24 = vmul.f32 %v77_v21, %v42_v22 }
 0x138   :  { %v86_v25 = vpop.eup %85 }
 0x139   :  { %v60_v26 = vadd.f32 %v78_v23, %v51_v24  ;;  %v43_v27 = vmul.f32 %v86_v25, %v27_v10 }
 0x13b   :  { %v81_v28 = vpack.c.bf16 %v60_v26, %v60_v26  ;;  %v52_v29 = vmul.f32 %v77_v21, %v43_v27 }
 0x13d   :  { %71 = vst.msk [vmem:[%s132_s3] sm:$0xf] %vm70_vm1, %v81_v28  ;;  %v61_v30 = vadd.f32 %v78_v23, %v52_v29 }
 0x13f   :  { %v82_v31 = vpack.c.bf16 %v61_v30, %v61_v30 }
 0x141   :  { %72 = vst.msk [vmem:[%s132_s3 + $0x4] sm:$0xf] %vm70_vm1, %v82_v31 }

// kernel: text_learnable_encoder_forward.12
= control target key start
LH: loop header
LB: loop body
LE: loop exit
PB: predicated region body
PF: predicated region fallthrough
CT: control target
= control target key end

     0   :  { %vm19_vm0 = vcmask 785408   ;;  %v151_v0 = vmov 0.0   ;;  %vm152_vm1 = vmmov 0   ;;  %vm47_vm2 = vcmask 261120   ;;  %s195_s1 = inlined_call_operand.vmem [shape: bf16[32,96], index: 1, kind: input, shape index: {}]   ;;  %s196_s0 = inlined_call_operand.vmem [shape: bf16[16,32], index: 0, kind: input, shape index: {}]   ;;  %s197_s2 = inlined_call_operand.vmem [shape: f32[1,96], index: 2, kind: input, shape index: {}]   ;;  %s198_s3 = inlined_call_operand.vmem [shape: bf16[16,96], index: 3, kind: output, shape index: {}]  }
   0x1   :  { %138 = vmatprep.subr.bf16.mxu0 %v151_v0  ;;  %v148_v1 = vld [vmem:[%s195_s1] sm:$0xff]   ;;  %142 = vmatprep.mubr.msk.bf16.mxu0 %vm152_vm1, %v151_v0  ;;  %20 = vst.msk [vmem:[#allocation2] sm:$0xff] %vm19_vm0, %v151_v0  ;;  %21 = vst.msk [vmem:[#allocation2 + $0x8] sm:$0xff] %vm19_vm0, %v151_v0  ;;  %v149_v2 = vld [vmem:[%s195_s1 + $0x8] sm:$0xff]   ;;  %vm119_vm3 = vcmask 781312  }
   0x2   :  { %139 = vmatpush3.bf16.msra.mxu0 %v148_v1  ;;  %v150_v3 = vld [vmem:[%s196_s0] sm:$0xff]  }
   0x3   :  { %140 = vmatprep.subr.bf16.mxu0 %v151_v0  ;;  %v130_v12 = vld [vmem:[%s197_s2] ss:$0 sm:$0xff] }
   0x6   :  { %141 = vmatpush3.bf16.msra.mxu0 %v149_v2 }
   0x8   :  { %v22_v4 = vld [vmem:[#allocation2] sm:$0xff]  ;;  %v23_v6 = vld [vmem:[#allocation2 + $0x8] sm:$0xff] }
   0x9   :  { %143 = vmatmul.mubr.msk.bf16.vlgmr.msra.gmra.mrb[0].mxu0 %vm47_vm2, %v150_v3 }
  0xdc   :  { %v85_v5 = vpop.f32.mrb[0].mxu0 }
  0xdd   :  { %v92_v7 = vadd.f32 %v85_v5, %v22_v4  ;;  %v144_v8 = vpop.f32.mrb[1].mxu0 }
  0xde   :  { %v88_v9 = vpop.f32.mrb[2].mxu0 }
  0xdf   :  { %95 = vst.msk [vmem:[#allocation2] sm:$0xff] %vm19_vm0, %v92_v7  ;;  %v93_v10 = vadd.f32 %v88_v9, %v23_v6  ;;  %v145_v11 = vpop.f32.mrb[3].mxu0 }
  0xe1   :  { %96 = vst.msk [vmem:[#allocation2 + $0x8] sm:$0xff] %vm19_vm0, %v93_v10 }
  0xe6   :  { %v100_v13 = vld [vmem:[#allocation2] sm:$0xff] }
  0xe7   :  { %v109_v14 = vadd.f32 %v130_v12, %v100_v13 }
  0xe8   :  { %v101_v15 = vld [vmem:[#allocation2 + $0x8] sm:$0xff] }
  0xe9   :  { %v133_v16 = vpack.c.bf16 %v109_v14, %v109_v14  ;;  %v110_v17 = vadd.f32 %v130_v12, %v101_v15 }
  0xeb   :  { %120 = vst.msk [vmem:[%s198_s3] sm:$0xf] %vm119_vm3, %v133_v16  ;;  %v134_v18 = vpack.c.bf16 %v110_v17, %v110_v17 }
  0xed   :  { %121 = vst.msk [vmem:[%s198_s3 + $0x4] sm:$0xf] %vm119_vm3, %v134_v18 }

// kernel: text_learnable_encoder_forward.13
= control target key start
LH: loop header
LB: loop body
LE: loop exit
PB: predicated region body
PF: predicated region fallthrough
CT: control target
= control target key end

     0   :  { %s683_s12 = smov 0   ;;  %s685_s13 = smov 0   ;;  %s751_s0 = inlined_call_operand.vmem [shape: bf16[2,4,8,8], index: 0, kind: input, shape index: {}]   ;;  %s752_s1 = inlined_call_operand.vmem [shape: bf16[2,4,8,8], index: 1, kind: input, shape index: {}]   ;;  %s753_s2 = inlined_call_operand.vmem [shape: bf16[2,4,8,8], index: 2, kind: input, shape index: {}]   ;;  %s754_s3 = inlined_call_operand.vmem [shape: bf16[2,4,8,8], index: 3, kind: output, shape index: {}]  }
   0x1   :  { %s687_s14 = smov 0   ;;  %s689_s15 = smov 0  }
   0x2   :  { %s691_s16 = smov 0  }
   0x3 LB: > { %s28_s17 = sadd.s32 1, %s651_s14  ;;  %s32_s18 = sadd.s32 1, %s655_s15  ;;  %s659_s16 = sphi %s691_s16, %s13_s16   ;;  %s655_s15 = sphi %s689_s15, %s758_s15   ;;  %s651_s14 = sphi %s687_s14, %s757_s14   ;;  %s647_s13 = sphi %s685_s13, %s756_s13   ;;  %s643_s12 = sphi %s683_s12, %s755_s12  }
   0x4   : > { %p30_p0 = scmp.ge.s32.totalorder %s28_s17, 4  ;;  %p546_p1 = scmp.ge.s32.totalorder %s659_s16, 1 }
   0x5   : > { %p200_p2 = scmp.lt.s32.totalorder %s659_s16, 9 }
   0x6   : > { %s760_s17 = smov (%p30_p0, %s28_s17), 0  ;;  %s762_s18 = smov (!%p30_p0, %s32_s18), %s655_s15 }
   0x7   : > { %p201_p3 = pnand %p546_p1, %p200_p2  ;;  %p34_p4 = scmp.ge.s32.totalorder %s762_s18, 2 }
   0x8   : > { %p252_p5 = scmp.lt.s32.totalorder (!%p201_p3), %s647_s13, 1  ;;  %p254_p6 = scmp.lt.s32.totalorder (!%p201_p3), %s643_s12, 3  ;;  %v661_v0 = vmov (!%p201_p3), 0.0   ;;  %vm662_vm0 = vmmov (!%p201_p3), 0   ;;  %vm294_vm1 = vcmask (!%p201_p3), 64512   ;;  %vm357_vm2 = vcmask (!%p201_p3), 1043456  }
   0x9   : > { %s764_s18 = smov (%p34_p4, %s762_s18), 0  ;;  %204 = sbr.rel (%p201_p3) target bundleno = 775 (0x307), region = 32 }
   0xa   : > { %563 = vmatprep.subr.bf16.mxu0 (!%p201_p3), %v661_v0  ;;  %565 = vmatprep.mubr.msk.bf16.mxu0 (!%p201_p3), %vm662_vm0, %v661_v0  ;;  %vm402_vm3 = vcmask (!%p201_p3), 60416  }
   0xb   : > { %569 = vmatprep.subr.bf16.mxu1 (!%p201_p3), %v661_v0  ;;  %571 = vmatprep.mubr.msk.bf16.mxu1 (!%p201_p3), %vm662_vm0, %v661_v0 }
  0x10   : > { %s766_s13 = smov (!%p252_p5, %s647_s13), 1  ;;  %s768_s12 = smov (!%p254_p6, %s643_s12), 3 }
  0x11   : > { %s547_s19 = sshll.u32 %s766_s13, 2 }
  0x12   : > { %s260_s20 = sadd.s32 %s547_s19, %s768_s12 }
  0x13   : > { %s713_s21 = sshll.u32 %s260_s20, 2 }
  0x14   : > { %s270_s24 = scalar_lea.vmem %s752_s1, %s713_s21  ;;  %s262_s27 = scalar_lea.vmem %s751_s0, %s713_s21 }
  0x15   : > { %v292_v1 = vld [vmem:[%s270_s24] sm:$0xf]  ;;  %s278_s30 = scalar_lea.vmem %s753_s2, %s713_s21  ;;  %s289_s6 = scalar_lea.vmem %s754_s3, %s713_s21 }
  0x16   : > { %v299_v2 = vsel %vm294_vm1, %v292_v1, 0  ;;  %v291_v3 = vld [vmem:[%s262_s27] sm:$0xf] }
  0x17   : > { %564 = vmatpush3.bf16.xpose.msra.mxu0 %v299_v2  ;;  %v293_v15 = vld [vmem:[%s278_s30] sm:$0xf] }
  0x18   : > { %v359_v16 = vsel %vm357_vm2, %v293_v15, 0 }
  0x19   : > { %570 = vmatpush3.bf16.msra.mxu1 %v359_v16 }
  0x1e   : > { %566 = vmatmul.mubr.msk.bf16.vlgmr.msra.gmra.mrb[0].mxu0 %vm294_vm1, %v291_v3 }
  0xf1   : > { %v335_v4 = vpop.f32.mrb[0].mxu0 }
  0xf2   : > { %v341_v5 = vmul.f32 0.35355338, %v335_v4  ;;  %v567_v6 = vpop.f32.mrb[1].mxu0 }
  0xf3   : > { %v338_v7 = vpop.f32.mrb[2].mxu0 }
  0xf4   : > { %v568_v8 = vpop.f32.mrb[3].mxu0  ;;  %v342_v9 = vsel %vm294_vm1, %v341_v5, -inf }
  0xf5   : > { %343 = vmax.xlane.f32.xlu0 %v342_v9 }
 0x182   : > { %v344_v10 = vpop.xlane.xlu0 %343 }
 0x183   : > { %v345_v11 = vsub.f32 %v341_v5, %v344_v10 }
 0x185   : > { %v346_v12 = vmul.f32 1.442695, %v345_v11 }
 0x187   : > { %617 = vpow2.f32 %v346_v12 }
 0x191   : > { %v618_v13 = vpop.eup %617 }
 0x192   : > { %v348_v14 = vsel %vm294_vm1, %v618_v13, 0.0 }
 0x193   : > { %349 = vadd.xlane.f32.xlu0 %v348_v14 }
 0x220   : > { %v350_v17 = vpop.xlane.xlu0 %349 }
 0x221   : > { %619 = vrcp.f32 %v350_v17 }
 0x22b   : > { %v620_v18 = vpop.eup %619 }
 0x22c   : > { %v352_v19 = vmul.f32 %v620_v18, %v618_v13 }
 0x22e   : > { %v353_v20 = vpack.c.bf16 %v352_v19, %v352_v19 }
 0x230   : > { %572 = vmatmul.mubr.msk.bf16.vlgmr.msra.gmra.mrb[0].mxu1 %vm294_vm1, %v353_v20 }
 0x303   : > { %v395_v21 = vpop.f32.mrb[0].mxu1 }
 0x304   : > { %v401_v22 = vpack.c.bf16 %v395_v21, %v395_v21  ;;  %v573_v23 = vpop.f32.mrb[1].mxu1 }
 0x305   : > { %v398_v24 = vpop.f32.mrb[2].mxu1 }
 0x306   : > { %403 = vst.msk [vmem:[%s289_s6] sm:$0xf] %vm402_vm3, %v401_v22  ;;  %v574_v25 = vpop.f32.mrb[3].mxu1 }
 0x307 PF: > { %s13_s16 = sadd.s32 1, %s659_s16   ;;  %s755_s12 = smov %s651_s14 }
 0x308   : > { %p10_p7 = scmp.ge.s32.totalorder %s13_s16, 10   ;;  %s756_s13 = smov %s655_s15 }
 0x309   : > { %s757_s14 = smov %s760_s17  ;;  %s758_s15 = smov %s764_s18 }
 0x30a   :  { %12 = sbr.rel (!%p10_p7) target bundleno = 3 (0x3), region = 68 }

// kernel: text_learnable_encoder_forward.14
= control target key start
LH: loop header
LB: loop body
LE: loop exit
PB: predicated region body
PF: predicated region fallthrough
CT: control target
= control target key end

     0   :  { %vm28_vm0 = vcmask 261120   ;;  %v220_v0 = vmov 0.0   ;;  %vm221_vm1 = vmmov 0   ;;  %vm178_vm2 = vcmask 257024   ;;  %s293_s1 = inlined_call_operand.vmem [shape: bf16[32,32], index: 1, kind: input, shape index: {}]   ;;  %s294_s0 = inlined_call_operand.vmem [shape: bf16[16,32], index: 0, kind: input, shape index: {}]   ;;  %s295_s3 = inlined_call_operand.vmem [shape: bf16[16,32], index: 3, kind: input, shape index: {}]   ;;  %s296_s2 = inlined_call_operand.vmem [shape: f32[1,32], index: 2, kind: input, shape index: {}]   ;;  %s297_s4 = inlined_call_operand.vmem [shape: f32[1,32], index: 4, kind: input, shape index: {}]   ;;  %s298_s5 = inlined_call_operand.vmem [shape: f32[1,32], index: 5, kind: input, shape index: {}]   ;;  %s299_s6 = inlined_call_operand.vmem [shape: bf16[16,32], index: 6, kind: output, shape index: {}]  }
   0x1   :  { %203 = vmatprep.subr.bf16.mxu0 %v220_v0  ;;  %v213_v1 = vld [vmem:[%s293_s1] sm:$0xff]   ;;  %207 = vmatprep.mubr.msk.bf16.mxu0 %vm221_vm1, %v220_v0  ;;  %29 = vst.msk [vmem:[#allocation2] sm:$0xff] %vm28_vm0, %v220_v0  ;;  %30 = vst.msk [vmem:[#allocation2 + $0x8] sm:$0xff] %vm28_vm0, %v220_v0  ;;  %v214_v2 = vld [vmem:[%s293_s1 + $0x8] sm:$0xff]  }
   0x2   :  { %204 = vmatpush3.bf16.msra.mxu0 %v213_v1  ;;  %v215_v3 = vld [vmem:[%s294_s0] sm:$0xff]  }
   0x3   :  { %205 = vmatprep.subr.bf16.mxu0 %v220_v0  ;;  %v197_v12 = vld [vmem:[%s295_s3] sm:$0xff]  }
   0x4   :  { %v189_v13 = vld [vmem:[%s296_s2] ss:$0 sm:$0xff]  ;;  %v198_v14 = vunpack.c.l.bf16 %v197_v12  ;;  %v199_v17 = vunpack.c.h.bf16 %v197_v12 }
   0x5   :  { %v190_v41 = vld [vmem:[%s297_s4] ss:$0 sm:$0xff] }
   0x6   :  { %206 = vmatpush3.bf16.msra.mxu0 %v214_v2  ;;  %v191_v43 = vld [vmem:[%s298_s5] ss:$0 sm:$0xff] }
   0x8   :  { %v31_v4 = vld [vmem:[#allocation2] sm:$0xff]  ;;  %v32_v6 = vld [vmem:[#allocation2 + $0x8] sm:$0xff] }
   0x9   :  { %208 = vmatmul.mubr.msk.bf16.vlgmr.msra.gmra.mrb[0].mxu0 %vm28_vm0, %v215_v3 }
  0xdc   :  { %v94_v5 = vpop.f32.mrb[0].mxu0 }
  0xdd   :  { %v101_v7 = vadd.f32 %v94_v5, %v31_v4  ;;  %v209_v8 = vpop.f32.mrb[1].mxu0 }
  0xde   :  { %v97_v9 = vpop.f32.mrb[2].mxu0 }
  0xdf   :  { %103 = vst.msk [vmem:[#allocation2] sm:$0xff] %vm28_vm0, %v101_v7  ;;  %v102_v10 = vadd.f32 %v97_v9, %v32_v6  ;;  %v210_v11 = vpop.f32.mrb[3].mxu0 }
  0xe1   :  { %104 = vst.msk [vmem:[#allocation2 + $0x8] sm:$0xff] %vm28_vm0, %v102_v10 }
  0xe6   :  { %v108_v15 = vld [vmem:[#allocation2] sm:$0xff] }
  0xe7   :  { %v117_v16 = vadd.f32 %v189_v13, %v108_v15 }
  0xe8   :  { %v109_v18 = vld [vmem:[#allocation2 + $0x8] sm:$0xff] }
  0xe9   :  { %v123_v19 = vadd.f32 %v198_v14, %v117_v16  ;;  %v118_v20 = vadd.f32 %v189_v13, %v109_v18 }
  0xeb   :  { %v125_v21 = vsel %vm28_vm0, %v123_v19, 0.0  ;;  %v124_v22 = vadd.f32 %v199_v17, %v118_v20 }
  0xec   :  { %126 = vadd.xlane.f32.xlu0 %v125_v21 }
  0xed   :  { %v128_v23 = vsel %vm28_vm0, %v124_v22, 0.0 }
  0xf0   :  { %129 = vadd.xlane.f32.xlu0 %v128_v23 }
 0x179   :  { %v127_v24 = vpop.xlane.xlu0 %126 }
 0x17a   :  { %v132_v25 = vmul.f32 0.03125, %v127_v24 }
 0x17c   :  { %v134_v26 = vsub.f32 %v123_v19, %v132_v25 }
 0x17d   :  { %v130_v27 = vpop.xlane.xlu0 %129 }
 0x17e   :  { %v133_v28 = vmul.f32 0.03125, %v130_v27  ;;  %v136_v29 = vmul.f32 %v134_v26, %v134_v26 }
 0x180   :  { %v135_v30 = vsub.f32 %v124_v22, %v133_v28  ;;  %v138_v31 = vsel %vm28_vm0, %v136_v29, 0.0 }
 0x181   :  { %139 = vadd.xlane.f32.xlu1 %v138_v31 }
 0x182   :  { %v137_v32 = vmul.f32 %v135_v30, %v135_v30 }
 0x184   :  { %v141_v33 = vsel %vm28_vm0, %v137_v32, 0.0 }
 0x185   :  { %142 = vadd.xlane.f32.xlu1 %v141_v33 }
 0x20e   :  { %v140_v34 = vpop.xlane.xlu1 %139 }
 0x20f   :  { %v144_v35 = vmul.f32 0.03125, %v140_v34 }
 0x211   :  { %v146_v36 = vadd.f32 1e-12, %v144_v35 }
 0x212   :  { %v143_v37 = vpop.xlane.xlu1 %142 }
 0x213   :  { %216 = vrsqrt.f32 %v146_v36  ;;  %v145_v38 = vmul.f32 0.03125, %v143_v37 }
 0x215   :  { %v147_v39 = vadd.f32 1e-12, %v145_v38 }
 0x217   :  { %218 = vrsqrt.f32 %v147_v39 }
 0x21d   :  { %v217_v40 = vpop.eup %216 }
 0x21e   :  { %v150_v42 = vmul.f32 %v217_v40, %v134_v26 }
 0x220   :  { %v159_v44 = vmul.f32 %v190_v41, %v150_v42 }
 0x221   :  { %v219_v45 = vpop.eup %218 }
 0x222   :  { %v168_v46 = vadd.f32 %v191_v43, %v159_v44  ;;  %v151_v47 = vmul.f32 %v219_v45, %v135_v30 }
 0x224   :  { %v194_v48 = vpack.c.bf16 %v168_v46, %v168_v46  ;;  %v160_v49 = vmul.f32 %v190_v41, %v151_v47 }
 0x226   :  { %179 = vst.msk [vmem:[%s299_s6] sm:$0xf] %vm178_vm2, %v194_v48  ;;  %v169_v50 = vadd.f32 %v191_v43, %v160_v49 }
 0x228   :  { %v195_v51 = vpack.c.bf16 %v169_v50, %v169_v50 }
 0x22a   :  { %180 = vst.msk [vmem:[%s299_s6 + $0x4] sm:$0xf] %vm178_vm2, %v195_v51 }

// kernel: text_learnable_encoder_forward.15
= control target key start
LH: loop header
LB: loop body
LE: loop exit
PB: predicated region body
PF: predicated region fallthrough
CT: control target
= control target key end

     0   :  { %vm19_vm0 = vcmask 523264   ;;  %v173_v0 = vmov 0.0   ;;  %vm174_vm1 = vmmov 0   ;;  %vm47_vm2 = vcmask 261120   ;;  %s217_s1 = inlined_call_operand.vmem [shape: bf16[32,64], index: 1, kind: input, shape index: {}]   ;;  %s218_s0 = inlined_call_operand.vmem [shape: bf16[16,32], index: 0, kind: input, shape index: {}]   ;;  %s219_s2 = inlined_call_operand.vmem [shape: f32[1,64], index: 2, kind: input, shape index: {}]   ;;  %s220_s3 = inlined_call_operand.vmem [shape: bf16[16,64], index: 3, kind: output, shape index: {}]  }
   0x1   :  { %156 = vmatprep.subr.bf16.mxu0 %v173_v0  ;;  %v166_v1 = vld [vmem:[%s217_s1] sm:$0xff]   ;;  %160 = vmatprep.mubr.msk.bf16.mxu0 %vm174_vm1, %v173_v0  ;;  %20 = vst.msk [vmem:[#allocation2] sm:$0xff] %vm19_vm0, %v173_v0  ;;  %21 = vst.msk [vmem:[#allocation2 + $0x8] sm:$0xff] %vm19_vm0, %v173_v0  ;;  %v167_v2 = vld [vmem:[%s217_s1 + $0x8] sm:$0xff]   ;;  %vm137_vm3 = vcmask 519168  }
   0x2   :  { %157 = vmatpush3.bf16.msra.mxu0 %v166_v1  ;;  %v168_v3 = vld [vmem:[%s218_s0] sm:$0xff]  }
   0x3   :  { %158 = vmatprep.subr.bf16.mxu0 %v173_v0  ;;  %v148_v12 = vld [vmem:[%s219_s2] ss:$0 sm:$0xff] }
   0x6   :  { %159 = vmatpush3.bf16.msra.mxu0 %v167_v2 }
   0x8   :  { %v22_v4 = vld [vmem:[#allocation2] sm:$0xff]  ;;  %v23_v6 = vld [vmem:[#allocation2 + $0x8] sm:$0xff] }
   0x9   :  { %161 = vmatmul.mubr.msk.bf16.vlgmr.msra.gmra.mrb[0].mxu0 %vm47_vm2, %v168_v3 }
  0xdc   :  { %v85_v5 = vpop.f32.mrb[0].mxu0 }
  0xdd   :  { %v92_v7 = vadd.f32 %v85_v5, %v22_v4  ;;  %v162_v8 = vpop.f32.mrb[1].mxu0 }
  0xde   :  { %v88_v9 = vpop.f32.mrb[2].mxu0 }
  0xdf   :  { %95 = vst.msk [vmem:[#allocation2] sm:$0xff] %vm19_vm0, %v92_v7  ;;  %v93_v10 = vadd.f32 %v88_v9, %v23_v6  ;;  %v163_v11 = vpop.f32.mrb[3].mxu0 }
  0xe1   :  { %96 = vst.msk [vmem:[#allocation2 + $0x8] sm:$0xff] %vm19_vm0, %v93_v10 }
  0xe6   :  { %v100_v13 = vld [vmem:[#allocation2] sm:$0xff] }
  0xe7   :  { %v109_v14 = vadd.f32 %v148_v12, %v100_v13 }
  0xe8   :  { %v101_v15 = vld [vmem:[#allocation2 + $0x8] sm:$0xff] }
  0xe9   :  { %v111_v16 = vmul.f32 %v109_v14, %v109_v14  ;;  %v110_v17 = vadd.f32 %v148_v12, %v101_v15 }
  0xeb   :  { %v113_v18 = vmul.f32 %v111_v16, %v109_v14  ;;  %v112_v19 = vmul.f32 %v110_v17, %v110_v17 }
  0xed   :  { %v115_v20 = vmul.f32 0.044715, %v113_v18  ;;  %v114_v21 = vmul.f32 %v112_v19, %v110_v17 }
  0xef   :  { %v117_v22 = vadd.f32 %v115_v20, %v109_v14  ;;  %v116_v23 = vmul.f32 0.044715, %v114_v21 }
  0xf1   :  { %v119_v24 = vmul.f32 0.7978846, %v117_v22  ;;  %v118_v25 = vadd.f32 %v116_v23, %v110_v17 }
  0xf3   :  { %169 = vtanh.f32 %v119_v24  ;;  %v120_v26 = vmul.f32 0.7978846, %v118_v25 }
  0xf5   :  { %171 = vtanh.f32 %v120_v26 }
  0xfd   :  { %v170_v27 = vpop.eup %169 }
  0xfe   :  { %v123_v28 = vadd.f32 1.0, %v170_v27 }
  0xff   :  { %v172_v29 = vpop.eup %171 }
 0x100   :  { %v125_v30 = vmul.f32 0.5, %v123_v28  ;;  %v124_v31 = vadd.f32 1.0, %v172_v29 }
 0x102   :  { %v127_v32 = vmul.f32 %v125_v30, %v109_v14  ;;  %v126_v33 = vmul.f32 0.5, %v124_v31 }
 0x104   :  { %v151_v34 = vpack.c.bf16 %v127_v32, %v127_v32  ;;  %v128_v35 = vmul.f32 %v126_v33, %v110_v17 }
 0x106   :  { %138 = vst.msk [vmem:[%s220_s3] sm:$0xf] %vm137_vm3, %v151_v34  ;;  %v152_v36 = vpack.c.bf16 %v128_v35, %v128_v35 }
 0x108   :  { %139 = vst.msk [vmem:[%s220_s3 + $0x4] sm:$0xf] %vm137_vm3, %v152_v36 }

// kernel: text_learnable_encoder_forward.16
= control target key start
LH: loop header
LB: loop body
LE: loop exit
PB: predicated region body
PF: predicated region fallthrough
CT: control target
= control target key end

     0   :  { %vm28_vm0 = vcmask 261120   ;;  %v247_v0 = vmov 0.0   ;;  %vm248_vm1 = vmmov 0   ;;  %vm72_vm2 = vcmask 523264   ;;  %s325_s1 = inlined_call_operand.vmem [shape: bf16[64,32], index: 1, kind: input, shape index: {}]   ;;  %s326_s0 = inlined_call_operand.vmem [shape: bf16[16,64], index: 0, kind: input, shape index: {}]   ;;  %s327_s3 = inlined_call_operand.vmem [shape: bf16[16,32], index: 3, kind: input, shape index: {}]   ;;  %s328_s2 = inlined_call_operand.vmem [shape: f32[1,32], index: 2, kind: input, shape index: {}]   ;;  %s329_s4 = inlined_call_operand.vmem [shape: f32[1,32], index: 4, kind: input, shape index: {}]   ;;  %s330_s5 = inlined_call_operand.vmem [shape: f32[1,32], index: 5, kind: input, shape index: {}]   ;;  %s331_s6 = inlined_call_operand.vmem [shape: bf16[16,32], index: 6, kind: output, shape index: {}]  }
   0x1   :  { %224 = vmatprep.subr.bf16.mxu0 %v247_v0  ;;  %v238_v1 = vld [vmem:[%s325_s1] sm:$0xff]   ;;  %232 = vmatprep.mubr.msk.bf16.mxu0 %vm248_vm1, %v247_v0  ;;  %29 = vst.msk [vmem:[#allocation2] sm:$0xff] %vm28_vm0, %v247_v0  ;;  %30 = vst.msk [vmem:[#allocation2 + $0x8] sm:$0xff] %vm28_vm0, %v247_v0  ;;  %v239_v2 = vld [vmem:[%s325_s1 + $0x8] sm:$0xff]   ;;  %vm195_vm3 = vcmask 257024  }
   0x2   :  { %225 = vmatpush3.bf16.msra.mxu0 %v238_v1  ;;  %v240_v3 = vld [vmem:[%s325_s1 + $0x10] sm:$0xff]   ;;  %v241_v4 = vld [vmem:[%s325_s1 + $0x18] sm:$0xff]   ;;  %v242_v5 = vld [vmem:[%s326_s0] sm:$0xff]  }
   0x3   :  { %226 = vmatprep.subr.bf16.mxu0 %v247_v0  ;;  %v216_v14 = vld [vmem:[%s327_s3] sm:$0xff]  }
   0x4   :  { %v208_v15 = vld [vmem:[%s328_s2] ss:$0 sm:$0xff]  ;;  %v217_v16 = vunpack.c.l.bf16 %v216_v14  ;;  %v218_v19 = vunpack.c.h.bf16 %v216_v14 }
   0x5   :  { %v209_v43 = vld [vmem:[%s329_s4] ss:$0 sm:$0xff] }
   0x6   :  { %227 = vmatpush3.bf16.msra.mxu0 %v239_v2  ;;  %v210_v45 = vld [vmem:[%s330_s5] ss:$0 sm:$0xff] }
   0x7   :  { %228 = vmatprep.subr.bf16.mxu0 %v247_v0 }
   0x8   :  { %v31_v6 = vld [vmem:[#allocation2] sm:$0xff]  ;;  %v32_v8 = vld [vmem:[#allocation2 + $0x8] sm:$0xff] }
   0xa   :  { %229 = vmatpush3.bf16.msra.mxu0 %v240_v3 }
   0xb   :  { %230 = vmatprep.subr.bf16.mxu0 %v247_v0 }
   0xe   :  { %231 = vmatpush3.bf16.msra.mxu0 %v241_v4 }
  0x11   :  { %233 = vmatmul.mubr.msk.bf16.vlgmr.msra.gmra.mrb[0].mxu0 %vm72_vm2, %v242_v5 }
  0xe4   :  { %v110_v7 = vpop.f32.mrb[0].mxu0 }
  0xe5   :  { %v117_v9 = vadd.f32 %v110_v7, %v31_v6  ;;  %v234_v10 = vpop.f32.mrb[1].mxu0 }
  0xe6   :  { %v113_v11 = vpop.f32.mrb[2].mxu0 }
  0xe7   :  { %120 = vst.msk [vmem:[#allocation2] sm:$0xff] %vm28_vm0, %v117_v9  ;;  %v118_v12 = vadd.f32 %v113_v11, %v32_v8  ;;  %v235_v13 = vpop.f32.mrb[3].mxu0 }
  0xe9   :  { %121 = vst.msk [vmem:[#allocation2 + $0x8] sm:$0xff] %vm28_vm0, %v118_v12 }
  0xee   :  { %v125_v17 = vld [vmem:[#allocation2] sm:$0xff] }
  0xef   :  { %v134_v18 = vadd.f32 %v208_v15, %v125_v17 }
  0xf0   :  { %v126_v20 = vld [vmem:[#allocation2 + $0x8] sm:$0xff] }
  0xf1   :  { %v140_v21 = vadd.f32 %v217_v16, %v134_v18  ;;  %v135_v22 = vadd.f32 %v208_v15, %v126_v20 }
  0xf3   :  { %v142_v23 = vsel %vm28_vm0, %v140_v21, 0.0  ;;  %v141_v24 = vadd.f32 %v218_v19, %v135_v22 }
  0xf4   :  { %143 = vadd.xlane.f32.xlu0 %v142_v23 }
  0xf5   :  { %v145_v25 = vsel %vm28_vm0, %v141_v24, 0.0 }
  0xf8   :  { %146 = vadd.xlane.f32.xlu0 %v145_v25 }
 0x181   :  { %v144_v26 = vpop.xlane.xlu0 %143 }
 0x182   :  { %v149_v27 = vmul.f32 0.03125, %v144_v26 }
 0x184   :  { %v151_v28 = vsub.f32 %v140_v21, %v149_v27 }
 0x185   :  { %v147_v29 = vpop.xlane.xlu0 %146 }
 0x186   :  { %v150_v30 = vmul.f32 0.03125, %v147_v29  ;;  %v153_v31 = vmul.f32 %v151_v28, %v151_v28 }
 0x188   :  { %v152_v32 = vsub.f32 %v141_v24, %v150_v30  ;;  %v155_v33 = vsel %vm28_vm0, %v153_v31, 0.0 }
 0x189   :  { %156 = vadd.xlane.f32.xlu1 %v155_v33 }
 0x18a   :  { %v154_v34 = vmul.f32 %v152_v32, %v152_v32 }
 0x18c   :  { %v158_v35 = vsel %vm28_vm0, %v154_v34, 0.0 }
 0x18d   :  { %159 = vadd.xlane.f32.xlu1 %v158_v35 }
 0x216   :  { %v157_v36 = vpop.xlane.xlu1 %156 }
 0x217   :  { %v161_v37 = vmul.f32 0.03125, %v157_v36 }
 0x219   :  { %v163_v38 = vadd.f32 1e-12, %v161_v37 }
 0x21a   :  { %v160_v39 = vpop.xlane.xlu1 %159 }
 0x21b   :  { %243 = vrsqrt.f32 %v163_v38  ;;  %v162_v40 = vmul.f32 0.03125, %v160_v39 }
 0x21d   :  { %v164_v41 = vadd.f32 1e-12, %v162_v40 }
 0x21f   :  { %245 = vrsqrt.f32 %v164_v41 }
 0x225   :  { %v244_v42 = vpop.eup %243 }
 0x226   :  { %v167_v44 = vmul.f32 %v244_v42, %v151_v28 }
 0x228   :  { %v176_v46 = vmul.f32 %v209_v43, %v167_v44 }
 0x229   :  { %v246_v47 = vpop.eup %245 }
 0x22a   :  { %v185_v48 = vadd.f32 %v210_v45, %v176_v46  ;;  %v168_v49 = vmul.f32 %v246_v47, %v152_v32 }
 0x22c   :  { %v213_v50 = vpack.c.bf16 %v185_v48, %v185_v48  ;;  %v177_v51 = vmul.f32 %v209_v43, %v168_v49 }
 0x22e   :  { %196 = vst.msk [vmem:[%s331_s6] sm:$0xf] %vm195_vm3, %v213_v50  ;;  %v186_v52 = vadd.f32 %v210_v45, %v177_v51 }
 0x230   :  { %v214_v53 = vpack.c.bf16 %v186_v52, %v186_v52 }
 0x232   :  { %197 = vst.msk [vmem:[%s331_s6 + $0x4] sm:$0xf] %vm195_vm3, %v214_v53 }

// kernel: text_learnable_encoder_forward.21
= control target key start
LH: loop header
LB: loop body
LE: loop exit
PB: predicated region body
PF: predicated region fallthrough
CT: control target
= control target key end

     0   :  { %v274_v1 = vmov 0.0   ;;  %vm275_vm0 = vmmov 0   ;;  %vm29_vm1 = vcmask 261120   ;;  %s363_s0 = inlined_call_operand.vmem [shape: bf16[16,64], index: 0, kind: input, shape index: {}]   ;;  %s364_s1 = inlined_call_operand.vmem [shape: bf16[64,32], index: 1, kind: input, shape index: {}]   ;;  %s365_s2 = inlined_call_operand.vmem [shape: f32[1,32], index: 2, kind: input, shape index: {}]   ;;  %s366_s3 = inlined_call_operand.vmem [shape: bf16[16,32], index: 3, kind: input, shape index: {}]   ;;  %s367_s4 = inlined_call_operand.vmem [shape: f32[1,32], index: 4, kind: input, shape index: {}]   ;;  %s368_s5 = inlined_call_operand.vmem [shape: f32[1,32], index: 5, kind: input, shape index: {}]   ;;  %s369_s6 = inlined_call_operand.hbm [shape: f32[16,32], index: 6, kind: output, shape index: {}]  }
   0x1   :  { %v241_v0 = vld [vmem:[%s364_s1] sm:$0xff]   ;;  %224 = vmatprep.subr.bf16.mxu0 %v274_v1  ;;  %v242_v2 = vld [vmem:[%s364_s1 + $0x8] sm:$0xff]   ;;  %232 = vmatprep.mubr.msk.bf16.mxu0 %vm275_vm0, %v274_v1  ;;  %30 = vst.msk [vmem:[#allocation2] sm:$0xff] %vm29_vm1, %v274_v1  ;;  %31 = vst.msk [vmem:[#allocation2 + $0x8] sm:$0xff] %vm29_vm1, %v274_v1 }
   0x2   :  { %225 = vmatpush3.bf16.msra.mxu0 %v241_v0 }
   0x3   :  { %226 = vmatprep.subr.bf16.mxu0 %v274_v1 }
   0x4   :  { %11 = vsyncpa [#allocation4], 0  ;;  %v243_v3 = vld [vmem:[%s364_s1 + $0x10] sm:$0xff]   ;;  %v244_v4 = vld [vmem:[%s364_s1 + $0x18] sm:$0xff]   ;;  %vm73_vm2 = vcmask 523264   ;;  %s276_s11 = smov [#allocation3]  }
   0x5   :  { %v245_v5 = vld [vmem:[%s363_s0] sm:$0xff]   ;;  %s195_s12 = sshll.u32 %s276_s11, 4  ;;  %s196_s12 = int_to_ptr.vmem [resolvable:$true] %s195_s12 }
   0x6   :  { %227 = vmatpush3.bf16.msra.mxu0 %v242_v2  ;;  %v216_v14 = vld [vmem:[%s366_s3] sm:$0xff]   ;;  %s250_s13 = scalar_lea.vmem %s196_s12, 256  ;;  %p255_p1 = scmp.lt.s32.totalorder %s196_s12, %s196_s12 }
   0x7   :  { %228 = vmatprep.subr.bf16.mxu0 %v274_v1  ;;  %v212_v15 = vld [vmem:[%s365_s2] ss:$0 sm:$0xff]  ;;  %v217_v16 = vunpack.c.l.bf16 %v216_v14  ;;  %v218_v19 = vunpack.c.h.bf16 %v216_v14  ;;  %p251_p0 = scmp.ne.s32.totalorder %s196_s12, %s250_s13  ;;  %p256_p2 = scmp.lt.s32.totalorder %s250_s13, %s250_s13 }
   0x8   :  { %v32_v6 = vld [vmem:[#allocation2] sm:$0xff]  ;;  %v33_v8 = vld [vmem:[#allocation2 + $0x8] sm:$0xff] }
   0x9   :  { %v213_v43 = vld [vmem:[%s367_s4] ss:$0 sm:$0xff]  ;;  %p257_p3 = por %p256_p2, %p255_p1 }
   0xa   :  { %229 = vmatpush3.bf16.msra.mxu0 %v243_v3  ;;  %v214_v45 = vld [vmem:[%s368_s5] ss:$0 sm:$0xff] }
   0xb   :  { %230 = vmatprep.subr.bf16.mxu0 %v274_v1  ;;  %p258_p4 = pnand %p257_p3, %p251_p0 }
   0xe   :  { %231 = vmatpush3.bf16.msra.mxu0 %v244_v4 }
  0x11   :  { %233 = vmatmul.mubr.msk.bf16.vlgmr.msra.gmra.mrb[0].mxu0 %vm73_vm2, %v245_v5 }
  0xe4   :  { %v111_v7 = vpop.f32.mrb[0].mxu0 }
  0xe5   :  { %v118_v9 = vadd.f32 %v111_v7, %v32_v6  ;;  %v234_v10 = vpop.f32.mrb[1].mxu0 }
  0xe6   :  { %v114_v11 = vpop.f32.mrb[2].mxu0 }
  0xe7   :  { %121 = vst.msk [vmem:[#allocation2] sm:$0xff] %vm29_vm1, %v118_v9  ;;  %v119_v12 = vadd.f32 %v114_v11, %v33_v8  ;;  %v235_v13 = vpop.f32.mrb[3].mxu0 }
  0xe9   :  { %122 = vst.msk [vmem:[#allocation2 + $0x8] sm:$0xff] %vm29_vm1, %v119_v12 }
  0xee   :  { %v126_v17 = vld [vmem:[#allocation2] sm:$0xff] }
  0xef   :  { %v135_v18 = vadd.f32 %v212_v15, %v126_v17 }
  0xf0   :  { %v127_v20 = vld [vmem:[#allocation2 + $0x8] sm:$0xff] }
  0xf1   :  { %v141_v21 = vadd.f32 %v217_v16, %v135_v18  ;;  %v136_v22 = vadd.f32 %v212_v15, %v127_v20 }
  0xf3   :  { %v143_v23 = vsel %vm29_vm1, %v141_v21, 0.0  ;;  %v142_v24 = vadd.f32 %v218_v19, %v136_v22 }
  0xf4   :  { %144 = vadd.xlane.f32.xlu0 %v143_v23 }
  0xf5   :  { %v146_v25 = vsel %vm29_vm1, %v142_v24, 0.0 }
  0xf8   :  { %147 = vadd.xlane.f32.xlu0 %v146_v25 }
 0x181   :  { %v145_v26 = vpop.xlane.xlu0 %144 }
 0x182   :  { %v150_v27 = vmul.f32 0.03125, %v145_v26 }
 0x184   :  { %v152_v28 = vsub.f32 %v141_v21, %v150_v27 }
 0x185   :  { %v148_v29 = vpop.xlane.xlu0 %147 }
 0x186   :  { %v151_v30 = vmul.f32 0.03125, %v148_v29  ;;  %v154_v31 = vmul.f32 %v152_v28, %v152_v28 }
 0x188   :  { %v153_v32 = vsub.f32 %v142_v24, %v151_v30  ;;  %v156_v33 = vsel %vm29_vm1, %v154_v31, 0.0 }
 0x189   :  { %157 = vadd.xlane.f32.xlu1 %v156_v33 }
 0x18a   :  { %v155_v34 = vmul.f32 %v153_v32, %v153_v32 }
 0x18c   :  { %v159_v35 = vsel %vm29_vm1, %v155_v34, 0.0 }
 0x18d   :  { %160 = vadd.xlane.f32.xlu1 %v159_v35 }
 0x216   :  { %v158_v36 = vpop.xlane.xlu1 %157 }
 0x217   :  { %v162_v37 = vmul.f32 0.03125, %v158_v36 }
 0x219   :  { %v164_v38 = vadd.f32 1e-12, %v162_v37 }
 0x21a   :  { %v161_v39 = vpop.xlane.xlu1 %160 }
 0x21b   :  { %246 = vrsqrt.f32 %v164_v38  ;;  %v163_v40 = vmul.f32 0.03125, %v161_v39 }
 0x21d   :  { %v165_v41 = vadd.f32 1e-12, %v163_v40 }
 0x21f   :  { %248 = vrsqrt.f32 %v165_v41 }
 0x225   :  { %v247_v42 = vpop.eup %246 }
 0x226   :  { %v168_v44 = vmul.f32 %v247_v42, %v152_v28 }
 0x228   :  { %v177_v46 = vmul.f32 %v213_v43, %v168_v44 }
 0x229   :  { %v249_v47 = vpop.eup %248 }
 0x22a   :  { %v169_v48 = vmul.f32 %v249_v47, %v153_v32  ;;  %v186_v49 = vadd.f32 %v214_v45, %v177_v46 }
 0x22c   :  { %v178_v50 = vmul.f32 %v213_v43, %v169_v48  ;;  %188 = vst.msk [vmem:[#allocation3] sm:$0xff] %vm29_vm1, %v186_v49 }
 0x22e   :  { %v187_v51 = vadd.f32 %v214_v45, %v178_v50 }
 0x230   :  { %189 = vst.msk [vmem:[#allocation3 + $0x8] sm:$0xff] %vm29_vm1, %v187_v51 }
 0x231   :  { %261 = shalt.err (!%p258_p4)
}
 0x232   :  { %s262_s14 = scalar_lea.hbm %s369_s6, 256 }
 0x233   :  { %p263_p5 = scmp.ne.s32.totalorder %s369_s6, %s262_s14  ;;  %p266_p6 = scmp.lt.u32.totalorder %s262_s14, %s369_s6 }
 0x235   :  { %p268_p7 = pnand %p266_p6, %p263_p5 }
 0x237   :  { %271 = shalt.err (!%p268_p7)
}
 0x238   :  { %s277_s19 = smov 128   ;;  %s278_s20 = smov 8  }
 0x239   :  { %201 = dma.vmem_to_hbm [thread:$0]  %s196_s12, 256, %s369_s6, [#allocation4], %s277_s19, %s277_s19, %s278_s20  }
 0x23a   :  { %272 = dma.done.wait [#allocation4], 256  }
 0x23b   :  { %273 = vsyncadd [#allocation4], 4294967040 }
 0x23c   :  { %205 = vsyncpa [#allocation4], 1 }

</bundles_post_ra>
